<compile_context>
chip_gen: v7x
topology: tpu7x:2x2x1
jax: 0.10.0
libtpu: 0.0.40
codegen_flags: <defaults>
</compile_context>

<pallas_src>
import functools

import jax
import jax.numpy as jnp
from jax.experimental import pallas as pl
from jax.experimental.pallas import tpu as pltpu

EPS = 1e-5
LANE = 128


def _round_up(x, m):
    return ((x + m - 1) // m) * m


# ----------------------------------------------------------------------------
# Pallas kernels: fused  (rows @ W_scaled) + shift (+ residual) (+ ReLU)
# ----------------------------------------------------------------------------
def _gemm_bn_kernel(x_ref, w_ref, b_ref, o_ref, *, relu):
    acc = jnp.dot(x_ref[...], w_ref[...], preferred_element_type=jnp.float32)
    y = acc + b_ref[...]
    if relu:
        y = jnp.maximum(y, 0.0)
    o_ref[...] = y.astype(o_ref.dtype)


def _gemm_bn_res_kernel(x_ref, w_ref, b_ref, r_ref, o_ref, *, relu):
    acc = jnp.dot(x_ref[...], w_ref[...], preferred_element_type=jnp.float32)
    y = acc + b_ref[...] + r_ref[...]
    if relu:
        y = jnp.maximum(y, 0.0)
    o_ref[...] = y.astype(o_ref.dtype)


def _choose_tiling(M, target):
    """Pick tm dividing M (multiple of 8) so no HBM pad copy is needed."""
    if M <= target:
        return M, M                      # single block == full dim (allowed)
    cand = (target // 8) * 8
    while cand >= 8:
        if M % cand == 0:
            return cand, M
        cand -= 8
    m_pad = _round_up(M, target)         # fallback (not hit for these shapes)
    return target, m_pad


def fused_matmul_bn(x_rows, w_mat, shift, res_rows, relu, tm_target=512):
    """x_rows (M,K) bf16 @ w_mat (K,Cpad) bf16 + shift (1,Cpad) f32
       (+ res_rows (M,Cpad) f32) (+ ReLU)  ->  (M,Cpad) f32."""
    M, K = x_rows.shape
    Kw, Cpad = w_mat.shape
    assert K == Kw and Cpad % LANE == 0

    # Clamp the tile target by a VMEM budget (keeps double-buffering alive on
    # v7x's 64 MiB while allowing big tiles on v5e/v6e's 128 MiB).
    budget = 24 << 20
    while tm_target > 128 and 2 * (tm_target * K * 2 + tm_target * Cpad * 8) > budget:
        tm_target //= 2
    tm, m_pad = _choose_tiling(M, tm_target)
    if m_pad != M:
        x_rows = jnp.pad(x_rows, ((0, m_pad - M), (0, 0)))
        if res_rows is not None:
            res_rows = jnp.pad(res_rows, ((0, m_pad - M), (0, 0)))

    x_spec = pl.BlockSpec((tm, K), lambda i: (i, 0))       # im2col rows tile
    w_spec = pl.BlockSpec((K, Cpad), lambda i: (0, 0))     # full weight (scaled)
    b_spec = pl.BlockSpec((1, Cpad), lambda i: (0, 0))     # BN shift
    o_spec = pl.BlockSpec((tm, Cpad), lambda i: (i, 0))    # lane-dense output

    has_res = res_rows is not None
    if has_res:
        kernel = functools.partial(_gemm_bn_res_kernel, relu=relu)
        in_specs = [x_spec, w_spec, b_spec,
                    pl.BlockSpec((tm, Cpad), lambda i: (i, 0))]
        args = (x_rows, w_mat, shift, res_rows)
    else:
        kernel = functools.partial(_gemm_bn_kernel, relu=relu)
        in_specs = [x_spec, w_spec, b_spec]
        args = (x_rows, w_mat, shift)

    # Explicit VMEM limit: actual double-buffered tile bytes + headroom.
    need = 2 * (tm * K * 2 + K * Cpad * 2 + 8 * Cpad * 4 + tm * Cpad * 4)
    if has_res:
        need += 2 * tm * Cpad * 4
    vmem_limit = int(min(64 << 20, max(2 * need + (1 << 20), 16 << 20)))

    out = pl.pallas_call(
        kernel,
        out_shape=jax.ShapeDtypeStruct((m_pad, Cpad), jnp.float32),
        grid_spec=pltpu.PrefetchScalarGridSpec(
            num_scalar_prefetch=0,
            grid=(m_pad // tm,),
            in_specs=in_specs,
            out_specs=o_spec),
        compiler_params=pltpu.CompilerParams(
            dimension_semantics=("parallel",),
            vmem_limit_bytes=vmem_limit),
    )(*args)
    return out[:M] if m_pad != M else out


# ----------------------------------------------------------------------------
# Plain-JAX glue: channels-last im2col, conv / conv-transpose wrappers
# ----------------------------------------------------------------------------
def im2col_3d(x, k, stride, pad):
    """x: (N,D,H,W,C) channels-last -> bf16 rows (N*Do*Ho*Wo, k^3*C)."""
    N, D, H, W, C = x.shape
    if pad:
        x = jnp.pad(x, ((0, 0), (pad, pad), (pad, pad), (pad, pad), (0, 0)))
    x = x.astype(jnp.bfloat16)   # bf16 matmul operand; halves im2col HBM bytes
    Do = (D + 2 * pad - k) // stride + 1
    Ho = (H + 2 * pad - k) // stride + 1
    Wo = (W + 2 * pad - k) // stride + 1
    cols = []
    for kd in range(k):
        for kh in range(k):
            for kw in range(k):
                cols.append(x[:,
                              kd:kd + (Do - 1) * stride + 1:stride,
                              kh:kh + (Ho - 1) * stride + 1:stride,
                              kw:kw + (Wo - 1) * stride + 1:stride, :])
    p = jnp.stack(cols, axis=4)                      # (N,Do,Ho,Wo,k^3,C)
    p = p.reshape(N * Do * Ho * Wo, k * k * k * C)   # K ordered (tap, channel)
    # TODO(synk): stream the k^3 taps inside the kernel with a reduction grid
    # axis + f32 accumulator instead of materializing the 27x im2col in HBM.
    return p, (N, Do, Ho, Wo)


def conv3d_bn(x, w, scale, shift, stride, residual=None, relu=True, pad=1):
    """Conv3d(k=3, bias=False) + BN(eval, folded) [+residual] [+ReLU]. NDHWC."""
    Cout, Cin, k, _, _ = w.shape
    patches, (N, Do, Ho, Wo) = im2col_3d(x, k, stride, pad)

    # (K, Cout) with K ordered (kd,kh,kw,cin) to match im2col; fold BN scale.
    w_mat = w.transpose(2, 3, 4, 1, 0).reshape(k * k * k * Cin, Cout)
    w_mat = w_mat * scale.reshape(1, Cout).astype(jnp.float32)

    Cpad = _round_up(Cout, LANE)                      # lane-dense output
    w_mat = jnp.pad(w_mat, ((0, 0), (0, Cpad - Cout))).astype(jnp.bfloat16)
    shift_p = jnp.pad(shift.reshape(1, Cout).astype(jnp.float32),
                      ((0, 0), (0, Cpad - Cout)))

    res_rows = None
    if residual is not None:
        res_rows = residual.reshape(N * Do * Ho * Wo, Cout).astype(jnp.float32)
        res_rows = jnp.pad(res_rows, ((0, 0), (0, Cpad - Cout)))

    out_rows = fused_matmul_bn(patches, w_mat, shift_p, res_rows, relu)
    return out_rows[:, :Cout].reshape(N, Do, Ho, Wo, Cout)


def convtranspose3d_bn(x, w, scale, shift, residual=None, relu=True,
                       stride=2, pad=1, out_pad=1):
    """ConvTranspose3d(k=3, bias=False) + BN(eval) [+residual] [+ReLU]. NDHWC."""
    Cin, Cout, k, _, _ = w.shape
    # equivalent forward conv: flip spatially, swap in/out channels
    w_eq = jnp.flip(w, axis=(2, 3, 4)).transpose(1, 0, 2, 3, 4)  # (Cout,Cin,k,k,k)
    N, D, H, W, C = x.shape
    Dd, Hd, Wd = (D - 1) * stride + 1, (H - 1) * stride + 1, (W - 1) * stride + 1
    xd = jnp.zeros((N, Dd, Hd, Wd, C), jnp.bfloat16)
    xd = xd.at[:, ::stride, ::stride, ::stride, :].set(x.astype(jnp.bfloat16))
    pp = k - 1 - pad   # = 1 for k=3, pad=1
    xd = jnp.pad(xd, ((0, 0),
                      (pp, pp + out_pad), (pp, pp + out_pad), (pp, pp + out_pad),
                      (0, 0)))
    # TODO(synk): replace the zero-dilated formulation with per-output-phase
    # (subpixel) convolutions to skip the 7/8 all-zero taps.
    return conv3d_bn(xd, w_eq, scale, shift, stride=1,
                     residual=residual, relu=relu, pad=0)


# ----------------------------------------------------------------------------
# hourglass module
# ----------------------------------------------------------------------------
def make_params(inplanes, key):
    """Deterministic synthetic parameters matching hourglass.__init__ shapes."""
    ip, ip2 = inplanes, inplanes * 2
    conv_shapes = {
        "w1": (ip2, ip, 3, 3, 3),    # conv1: Conv3d(ip -> 2ip, s2)
        "w2": (ip2, ip2, 3, 3, 3),   # conv2: Conv3d(2ip -> 2ip, s1)
        "w3": (ip2, ip2, 3, 3, 3),   # conv3: Conv3d(2ip -> 2ip, s2)
        "w4": (ip2, ip2, 3, 3, 3),   # conv4: Conv3d(2ip -> 2ip, s1)
        "w5": (ip2, ip2, 3, 3, 3),   # conv5: ConvTranspose3d(2ip -> 2ip, s2)
        "w6": (ip2, ip, 3, 3, 3),    # conv6: ConvTranspose3d(2ip -> ip,  s2)
    }
    bn_channels = {"1": ip2, "2": ip2, "3": ip2, "4": ip2, "5": ip2, "6": ip}
    params = {}
    keys = jax.random.split(key, 6 * 5)
    ki = 0
    for idx in "123456":
        cshape = conv_shapes["w" + idx]
        fan_in = cshape[1] * 27
        params["w" + idx] = (jax.random.normal(keys[ki], cshape, jnp.float32)
                             * (1.0 / jnp.sqrt(fan_in)))
        ki += 1
        C = bn_channels[idx]
        gamma = 1.0 + 0.1 * jax.random.normal(keys[ki], (C,), jnp.float32); ki += 1
        beta = 0.1 * jax.random.normal(keys[ki], (C,), jnp.float32);        ki += 1
        mean = 0.1 * jax.random.normal(keys[ki], (C,), jnp.float32);        ki += 1
        var = 1.0 + 0.1 * jax.random.uniform(keys[ki], (C,), jnp.float32);  ki += 1
        scale = gamma / jnp.sqrt(var + EPS)
        shift = beta - mean * scale
        params["s" + idx] = scale
        params["b" + idx] = shift
    return params


def hourglass_forward(x, params, presqu=None, postsqu=None):
    """x, presqu, postsqu in PyTorch NCDHW layout; outputs NCDHW."""
    to_cl = lambda t: jnp.transpose(t, (0, 2, 3, 4, 1))    # NCDHW -> NDHWC
    to_cf = lambda t: jnp.transpose(t, (0, 4, 1, 2, 3))    # NDHWC -> NCDHW
    x_cl = to_cl(x)
    presqu_cl = None if presqu is None else to_cl(presqu)
    postsqu_cl = None if postsqu is None else to_cl(postsqu)

    p = params
    out = conv3d_bn(x_cl, p["w1"], p["s1"], p["b1"], stride=2, relu=True)   # conv1
    # conv2 + (optional postsqu residual) + ReLU fused in the kernel
    pre = conv3d_bn(out, p["w2"], p["s2"], p["b2"], stride=1,
                    residual=postsqu_cl, relu=True)
    out = conv3d_bn(pre, p["w3"], p["s3"], p["b3"], stride=2, relu=True)    # conv3
    out = conv3d_bn(out, p["w4"], p["s4"], p["b4"], stride=1, relu=True)    # conv4
    res5 = presqu_cl if presqu is not None else pre
    post = convtranspose3d_bn(out, p["w5"], p["s5"], p["b5"],
                              residual=res5, relu=True)                     # conv5
    out = convtranspose3d_bn(post, p["w6"], p["s6"], p["b6"],
                             residual=None, relu=False)                     # conv6
    return to_cf(out), to_cf(pre), to_cf(post)


if __name__ == "__main__":
    key = jax.random.PRNGKey(0)
    k_x, k_pre, k_post, k_par = jax.random.split(key, 4)

    inplanes = 4
    N, D, H, W = 2, 8, 8, 8
    x = jax.random.normal(k_x, (N, inplanes, D, H, W), jnp.float32)
    presqu = jax.random.normal(k_pre, (N, inplanes * 2, D // 2, H // 2, W // 2),
                               jnp.float32)
    postsqu = jax.random.normal(k_post, (N, inplanes * 2, D // 2, H // 2, W // 2),
                                jnp.float32)

    params = make_params(inplanes, k_par)

    fwd = jax.jit(hourglass_forward)
    out, pre, post = fwd(x, params, presqu, postsqu)
    jax.block_until_ready((out, pre, post))

    assert out.shape == (N, inplanes, D, H, W)
    assert pre.shape == (N, inplanes * 2, D // 2, H // 2, W // 2)
    assert post.shape == (N, inplanes * 2, D // 2, H // 2, W // 2)
    assert jnp.all(jnp.isfinite(out)) and jnp.all(jnp.isfinite(pre)) \
        and jnp.all(jnp.isfinite(post))

    print("KERNEL_OK")
</pallas_src>

<mosaic_0001>
module attributes {stable_mosaic.version = 11 : i64} {
  func.func @_gemm_bn_kernel(%arg0: i32, %arg1: memref<128x108xbf16, #tpu.memory_space<vmem>>, %arg2: memref<108x128xbf16, #tpu.memory_space<vmem>>, %arg3: memref<1x128xf32, #tpu.memory_space<vmem>>, %arg4: memref<128x128xf32, #tpu.memory_space<vmem>>) attributes {dimension_semantics = [#tpu.dimension_semantics<parallel>], iteration_bounds = array<i64: 1>, scalar_prefetch = 0 : i64, scratch_operands = 0 : i64, tpu.core_type = #tpu.core_type<tc>, window_params = [{transform_indices = @transform_0, window_bounds = array<i64: 128, 108>}, {pipeline_mode = #tpu.pipeline_mode<synchronous>, transform_indices = @transform_1, window_bounds = array<i64: 108, 128>}, {pipeline_mode = #tpu.pipeline_mode<synchronous>, transform_indices = @transform_2, window_bounds = array<i64: 1, 128>}, {transform_indices = @transform_3, window_bounds = array<i64: 128, 128>}]} {
    %c0 = arith.constant 0 : index
    %c0_0 = arith.constant 0 : index
    %0 = vector.load %arg1[%c0, %c0_0] : memref<128x108xbf16, #tpu.memory_space<vmem>>, vector<128x108xbf16>
    %c0_1 = arith.constant 0 : index
    %c0_2 = arith.constant 0 : index
    %1 = vector.load %arg2[%c0_1, %c0_2] : memref<108x128xbf16, #tpu.memory_space<vmem>>, vector<108x128xbf16>
    %cst = arith.constant dense<0.000000e+00> : vector<128x128xf32>
    %2 = tpu.matmul %0, %1, %cst {dimension_numbers = #tpu.dot_dimension_numbers<[1], [0], [0], [1], [0, 0, 1, 1], [], []>} : vector<128x108xbf16>, vector<108x128xbf16>, vector<128x128xf32> -> vector<128x128xf32>
    %c0_3 = arith.constant 0 : index
    %c0_4 = arith.constant 0 : index
    %3 = vector.load %arg3[%c0_3, %c0_4] : memref<1x128xf32, #tpu.memory_space<vmem>>, vector<1x128xf32>
    %4 = vector.broadcast %3 : vector<1x128xf32> to vector<128x128xf32>
    %5 = arith.addf %2, %4 : vector<128x128xf32>
    %cst_5 = arith.constant 0.000000e+00 : f32
    %6 = vector.broadcast %cst_5 : f32 to vector<128x128xf32>
    %7 = arith.maximumf %5, %6 : vector<128x128xf32>
    %c0_6 = arith.constant 0 : index
    %c0_7 = arith.constant 0 : index
    %8 = vector.load %arg4[%c0_6, %c0_7] : memref<128x128xf32, #tpu.memory_space<vmem>>, vector<128x128xf32>
    tpu.vector_store %arg4[%c0_6, %c0_7], %7 {strides = array<i32>} : memref<128x128xf32, #tpu.memory_space<vmem>>, vector<128x128xf32>,
    return
  }
  func.func @transform_0(%arg0: i32) -> (i32, i32) {
    %c0_i32 = arith.constant 0 : i32
    %c0_i32_0 = arith.constant 0 : i32
    return %arg0, %c0_i32 : i32, i32
  }
  func.func @transform_1(%arg0: i32) -> (i32, i32) {
    %c0_i32 = arith.constant 0 : i32
    %c0_i32_0 = arith.constant 0 : i32
    %c0_i32_1 = arith.constant 0 : i32
    return %c0_i32, %c0_i32_0 : i32, i32
  }
  func.func @transform_2(%arg0: i32) -> (i32, i32) {
    %c0_i32 = arith.constant 0 : i32
    %c0_i32_0 = arith.constant 0 : i32
    %c0_i32_1 = arith.constant 0 : i32
    return %c0_i32, %c0_i32_0 : i32, i32
  }
  func.func @transform_3(%arg0: i32) -> (i32, i32) {
    %c0_i32 = arith.constant 0 : i32
    %c0_i32_0 = arith.constant 0 : i32
    return %arg0, %c0_i32 : i32, i32
  }
}

module attributes {stable_mosaic.version = 11 : i64} {
  func.func @_gemm_bn_res_kernel(%arg0: i32, %arg1: memref<128x216xbf16, #tpu.memory_space<vmem>>, %arg2: memref<216x128xbf16, #tpu.memory_space<vmem>>, %arg3: memref<1x128xf32, #tpu.memory_space<vmem>>, %arg4: memref<128x128xf32, #tpu.memory_space<vmem>>, %arg5: memref<128x128xf32, #tpu.memory_space<vmem>>) attributes {dimension_semantics = [#tpu.dimension_semantics<parallel>], iteration_bounds = array<i64: 1>, scalar_prefetch = 0 : i64, scratch_operands = 0 : i64, tpu.core_type = #tpu.core_type<tc>, window_params = [{transform_indices = @transform_0, window_bounds = array<i64: 128, 216>}, {pipeline_mode = #tpu.pipeline_mode<synchronous>, transform_indices = @transform_1, window_bounds = array<i64: 216, 128>}, {pipeline_mode = #tpu.pipeline_mode<synchronous>, transform_indices = @transform_2, window_bounds = array<i64: 1, 128>}, {transform_indices = @transform_3, window_bounds = array<i64: 128, 128>}, {transform_indices = @transform_4, window_bounds = array<i64: 128, 128>}]} {
    %c0 = arith.constant 0 : index
    %c0_0 = arith.constant 0 : index
    %0 = vector.load %arg1[%c0, %c0_0] : memref<128x216xbf16, #tpu.memory_space<vmem>>, vector<128x216xbf16>
    %c0_1 = arith.constant 0 : index
    %c0_2 = arith.constant 0 : index
    %1 = vector.load %arg2[%c0_1, %c0_2] : memref<216x128xbf16, #tpu.memory_space<vmem>>, vector<216x128xbf16>
    %cst = arith.constant dense<0.000000e+00> : vector<128x128xf32>
    %2 = tpu.matmul %0, %1, %cst {dimension_numbers = #tpu.dot_dimension_numbers<[1], [0], [0], [1], [0, 0, 1, 1], [], []>} : vector<128x216xbf16>, vector<216x128xbf16>, vector<128x128xf32> -> vector<128x128xf32>
    %c0_3 = arith.constant 0 : index
    %c0_4 = arith.constant 0 : index
    %3 = vector.load %arg3[%c0_3, %c0_4] : memref<1x128xf32, #tpu.memory_space<vmem>>, vector<1x128xf32>
    %4 = vector.broadcast %3 : vector<1x128xf32> to vector<128x128xf32>
    %5 = arith.addf %2, %4 : vector<128x128xf32>
    %c0_5 = arith.constant 0 : index
    %c0_6 = arith.constant 0 : index
    %6 = vector.load %arg4[%c0_5, %c0_6] : memref<128x128xf32, #tpu.memory_space<vmem>>, vector<128x128xf32>
    %7 = arith.addf %5, %6 : vector<128x128xf32>
    %cst_7 = arith.constant 0.000000e+00 : f32
    %8 = vector.broadcast %cst_7 : f32 to vector<128x128xf32>
    %9 = arith.maximumf %7, %8 : vector<128x128xf32>
    %c0_8 = arith.constant 0 : index
    %c0_9 = arith.constant 0 : index
    %10 = vector.load %arg5[%c0_8, %c0_9] : memref<128x128xf32, #tpu.memory_space<vmem>>, vector<128x128xf32>
    tpu.vector_store %arg5[%c0_8, %c0_9], %9 {strides = array<i32>} : memref<128x128xf32, #tpu.memory_space<vmem>>, vector<128x128xf32>,
    return
  }
  func.func @transform_0(%arg0: i32) -> (i32, i32) {
    %c0_i32 = arith.constant 0 : i32
    %c0_i32_0 = arith.constant 0 : i32
    return %arg0, %c0_i32 : i32, i32
  }
  func.func @transform_1(%arg0: i32) -> (i32, i32) {
    %c0_i32 = arith.constant 0 : i32
    %c0_i32_0 = arith.constant 0 : i32
    %c0_i32_1 = arith.constant 0 : i32
    return %c0_i32, %c0_i32_0 : i32, i32
  }
  func.func @transform_2(%arg0: i32) -> (i32, i32) {
    %c0_i32 = arith.constant 0 : i32
    %c0_i32_0 = arith.constant 0 : i32
    %c0_i32_1 = arith.constant 0 : i32
    return %c0_i32, %c0_i32_0 : i32, i32
  }
  func.func @transform_3(%arg0: i32) -> (i32, i32) {
    %c0_i32 = arith.constant 0 : i32
    %c0_i32_0 = arith.constant 0 : i32
    return %arg0, %c0_i32 : i32, i32
  }
  func.func @transform_4(%arg0: i32) -> (i32, i32) {
    %c0_i32 = arith.constant 0 : i32
    %c0_i32_0 = arith.constant 0 : i32
    return %arg0, %c0_i32 : i32, i32
  }
}

module attributes {stable_mosaic.version = 11 : i64} {
  func.func @_gemm_bn_kernel(%arg0: i32, %arg1: memref<16x216xbf16, #tpu.memory_space<vmem>>, %arg2: memref<216x128xbf16, #tpu.memory_space<vmem>>, %arg3: memref<1x128xf32, #tpu.memory_space<vmem>>, %arg4: memref<16x128xf32, #tpu.memory_space<vmem>>) attributes {dimension_semantics = [#tpu.dimension_semantics<parallel>], iteration_bounds = array<i64: 1>, scalar_prefetch = 0 : i64, scratch_operands = 0 : i64, tpu.core_type = #tpu.core_type<tc>, window_params = [{transform_indices = @transform_0, window_bounds = array<i64: 16, 216>}, {pipeline_mode = #tpu.pipeline_mode<synchronous>, transform_indices = @transform_1, window_bounds = array<i64: 216, 128>}, {pipeline_mode = #tpu.pipeline_mode<synchronous>, transform_indices = @transform_2, window_bounds = array<i64: 1, 128>}, {transform_indices = @transform_3, window_bounds = array<i64: 16, 128>}]} {
    %c0 = arith.constant 0 : index
    %c0_0 = arith.constant 0 : index
    %0 = vector.load %arg1[%c0, %c0_0] : memref<16x216xbf16, #tpu.memory_space<vmem>>, vector<16x216xbf16>
    %c0_1 = arith.constant 0 : index
    %c0_2 = arith.constant 0 : index
    %1 = vector.load %arg2[%c0_1, %c0_2] : memref<216x128xbf16, #tpu.memory_space<vmem>>, vector<216x128xbf16>
    %cst = arith.constant dense<0.000000e+00> : vector<16x128xf32>
    %2 = tpu.matmul %0, %1, %cst {dimension_numbers = #tpu.dot_dimension_numbers<[1], [0], [0], [1], [0, 0, 1, 1], [], []>} : vector<16x216xbf16>, vector<216x128xbf16>, vector<16x128xf32> -> vector<16x128xf32>
    %c0_3 = arith.constant 0 : index
    %c0_4 = arith.constant 0 : index
    %3 = vector.load %arg3[%c0_3, %c0_4] : memref<1x128xf32, #tpu.memory_space<vmem>>, vector<1x128xf32>
    %4 = vector.broadcast %3 : vector<1x128xf32> to vector<16x128xf32>
    %5 = arith.addf %2, %4 : vector<16x128xf32>
    %cst_5 = arith.constant 0.000000e+00 : f32
    %6 = vector.broadcast %cst_5 : f32 to vector<16x128xf32>
    %7 = arith.maximumf %5, %6 : vector<16x128xf32>
    %c0_6 = arith.constant 0 : index
    %c0_7 = arith.constant 0 : index
    %8 = vector.load %arg4[%c0_6, %c0_7] : memref<16x128xf32, #tpu.memory_space<vmem>>, vector<16x128xf32>
    tpu.vector_store %arg4[%c0_6, %c0_7], %7 {strides = array<i32>} : memref<16x128xf32, #tpu.memory_space<vmem>>, vector<16x128xf32>,
    return
  }
  func.func @transform_0(%arg0: i32) -> (i32, i32) {
    %c0_i32 = arith.constant 0 : i32
    %c0_i32_0 = arith.constant 0 : i32
    return %arg0, %c0_i32 : i32, i32
  }
  func.func @transform_1(%arg0: i32) -> (i32, i32) {
    %c0_i32 = arith.constant 0 : i32
    %c0_i32_0 = arith.constant 0 : i32
    %c0_i32_1 = arith.constant 0 : i32
    return %c0_i32, %c0_i32_0 : i32, i32
  }
  func.func @transform_2(%arg0: i32) -> (i32, i32) {
    %c0_i32 = arith.constant 0 : i32
    %c0_i32_0 = arith.constant 0 : i32
    %c0_i32_1 = arith.constant 0 : i32
    return %c0_i32, %c0_i32_0 : i32, i32
  }
  func.func @transform_3(%arg0: i32) -> (i32, i32) {
    %c0_i32 = arith.constant 0 : i32
    %c0_i32_0 = arith.constant 0 : i32
    return %arg0, %c0_i32 : i32, i32
  }
}

module attributes {stable_mosaic.version = 11 : i64} {
  func.func @_gemm_bn_kernel(%arg0: i32, %arg1: memref<512x216xbf16, #tpu.memory_space<vmem>>, %arg2: memref<216x128xbf16, #tpu.memory_space<vmem>>, %arg3: memref<1x128xf32, #tpu.memory_space<vmem>>, %arg4: memref<512x128xf32, #tpu.memory_space<vmem>>) attributes {dimension_semantics = [#tpu.dimension_semantics<parallel>], iteration_bounds = array<i64: 2>, scalar_prefetch = 0 : i64, scratch_operands = 0 : i64, tpu.core_type = #tpu.core_type<tc>, window_params = [{transform_indices = @transform_0, window_bounds = array<i64: 512, 216>}, {pipeline_mode = #tpu.pipeline_mode<synchronous>, transform_indices = @transform_1, window_bounds = array<i64: 216, 128>}, {pipeline_mode = #tpu.pipeline_mode<synchronous>, transform_indices = @transform_2, window_bounds = array<i64: 1, 128>}, {transform_indices = @transform_3, window_bounds = array<i64: 512, 128>}]} {
    %c0 = arith.constant 0 : index
    %c0_0 = arith.constant 0 : index
    %0 = vector.load %arg1[%c0, %c0_0] : memref<512x216xbf16, #tpu.memory_space<vmem>>, vector<512x216xbf16>
    %c0_1 = arith.constant 0 : index
    %c0_2 = arith.constant 0 : index
    %1 = vector.load %arg2[%c0_1, %c0_2] : memref<216x128xbf16, #tpu.memory_space<vmem>>, vector<216x128xbf16>
    %cst = arith.constant dense<0.000000e+00> : vector<512x128xf32>
    %2 = tpu.matmul %0, %1, %cst {dimension_numbers = #tpu.dot_dimension_numbers<[1], [0], [0], [1], [0, 0, 1, 1], [], []>} : vector<512x216xbf16>, vector<216x128xbf16>, vector<512x128xf32> -> vector<512x128xf32>
    %c0_3 = arith.constant 0 : index
    %c0_4 = arith.constant 0 : index
    %3 = vector.load %arg3[%c0_3, %c0_4] : memref<1x128xf32, #tpu.memory_space<vmem>>, vector<1x128xf32>
    %4 = vector.broadcast %3 : vector<1x128xf32> to vector<512x128xf32>
    %5 = arith.addf %2, %4 : vector<512x128xf32>
    %c0_5 = arith.constant 0 : index
    %c0_6 = arith.constant 0 : index
    %6 = vector.load %arg4[%c0_5, %c0_6] : memref<512x128xf32, #tpu.memory_space<vmem>>, vector<512x128xf32>
    tpu.vector_store %arg4[%c0_5, %c0_6], %5 {strides = array<i32>} : memref<512x128xf32, #tpu.memory_space<vmem>>, vector<512x128xf32>,
    return
  }
  func.func @transform_0(%arg0: i32) -> (i32, i32) {
    %c0_i32 = arith.constant 0 : i32
    %c0_i32_0 = arith.constant 0 : i32
    return %arg0, %c0_i32 : i32, i32
  }
  func.func @transform_1(%arg0: i32) -> (i32, i32) {
    %c0_i32 = arith.constant 0 : i32
    %c0_i32_0 = arith.constant 0 : i32
    %c0_i32_1 = arith.constant 0 : i32
    return %c0_i32, %c0_i32_0 : i32, i32
  }
  func.func @transform_2(%arg0: i32) -> (i32, i32) {
    %c0_i32 = arith.constant 0 : i32
    %c0_i32_0 = arith.constant 0 : i32
    %c0_i32_1 = arith.constant 0 : i32
    return %c0_i32, %c0_i32_0 : i32, i32
  }
  func.func @transform_3(%arg0: i32) -> (i32, i32) {
    %c0_i32 = arith.constant 0 : i32
    %c0_i32_0 = arith.constant 0 : i32
    return %arg0, %c0_i32 : i32, i32
  }
}

</mosaic_0001>

<bundles_post_ra>
// kernel: hourglass_forward.6
= control target key start
LH: loop header
LB: loop body
LE: loop exit
PB: predicated region body
PF: predicated region fallthrough
CT: control target
= control target key end

     0   :  { %vm133_vm0 = vcmask 883712   ;;  %vm158_vm1 = vcmask 1045504   ;;  %s519_s1 = inlined_call_operand.vmem [shape: bf16[108,128], index: 1, kind: input, shape index: {}]   ;;  %s520_s0 = inlined_call_operand.vmem [shape: bf16[128,108], index: 0, kind: input, shape index: {}]   ;;  %s521_s2 = inlined_call_operand.vmem [shape: f32[1,128], index: 2, kind: input, shape index: {}]   ;;  %s522_s3 = inlined_call_operand.vmem [shape: f32[128,128], index: 3, kind: output, shape index: {}]  }
   0x1   :  { %v380_v0 = vld [vmem:[%s519_s1] sm:$0xff]   ;;  %v381_v1 = vld [vmem:[%s519_s1 + $0x8] sm:$0xff]   ;;  %v382_v2 = vld [vmem:[%s519_s1 + $0x10] sm:$0xff]  }
   0x2   :  { %334 = vmatprep.subr.bf16.mxu0 %v380_v0  ;;  %364 = vmatprep.subr.bf16.mxu1 %v380_v0  ;;  %v383_v3 = vld [vmem:[%s519_s1 + $0x18] sm:$0xff]   ;;  %v387_v4 = vld [vmem:[%s520_s0] sm:$0xff]   ;;  %v385_v7 = vld [vmem:[%s519_s1 + $0x28] sm:$0xff]  }
   0x3   :  { %335 = vmatpush3.bf16.msra.mxu0 %v380_v0  ;;  %371 = vmatpush3.bf16.msra.mxu1 %v380_v0  ;;  %v388_v5 = vld [vmem:[%s520_s0 + $0x20] sm:$0xff]   ;;  %v386_v8 = vld [vmem:[%s519_s1 + $0x30] sm:$0x3f]   ;;  %v389_v10 = vld [vmem:[%s520_s0 + $0x8] sm:$0xff]  }
   0x4   :  { %336 = vmatprep.subr.bf16.mxu0 %v381_v1  ;;  %365 = vmatprep.subr.bf16.mxu1 %v381_v1  ;;  %v384_v6 = vld [vmem:[%s519_s1 + $0x20] sm:$0xff]   ;;  %v160_v9 = vsel %vm158_vm1, %v386_v8, 0  ;;  %v390_v11 = vld [vmem:[%s520_s0 + $0x28] sm:$0xff]   ;;  %v391_v12 = vld [vmem:[%s520_s0 + $0x10] sm:$0xff]  }
   0x5   :  { %348 = vmatprep.mubr.msk.bf16.mxu0 %vm133_vm0, %v387_v4  ;;  %356 = vmatprep.mubr.msk.bf16.mxu1 %vm133_vm0, %v388_v5  ;;  %v392_v13 = vld [vmem:[%s520_s0 + $0x30] sm:$0xff]   ;;  %v393_v14 = vld [vmem:[%s520_s0 + $0x18] sm:$0xff]   ;;  %v295_v16 = vld [vmem:[%s521_s2] ss:$0 sm:$0xff] }
   0x6   :  { %v394_v15 = vld [vmem:[%s520_s0 + $0x38] sm:$0xff]  }
   0x7   :  { %337 = vmatpush3.bf16.msra.mxu0 %v381_v1  ;;  %372 = vmatpush3.bf16.msra.mxu1 %v381_v1 }
   0x8   :  { %338 = vmatprep.subr.bf16.mxu0 %v382_v2  ;;  %366 = vmatprep.subr.bf16.mxu1 %v382_v2 }
   0xb   :  { %339 = vmatpush3.bf16.msra.mxu0 %v382_v2  ;;  %373 = vmatpush3.bf16.msra.mxu1 %v382_v2 }
   0xc   :  { %340 = vmatprep.subr.bf16.mxu0 %v383_v3  ;;  %367 = vmatprep.subr.bf16.mxu1 %v383_v3 }
   0xf   :  { %341 = vmatpush3.bf16.msra.mxu0 %v383_v3  ;;  %374 = vmatpush3.bf16.msra.mxu1 %v383_v3 }
  0x10   :  { %342 = vmatprep.subr.bf16.mxu0 %v384_v6  ;;  %368 = vmatprep.subr.bf16.mxu1 %v384_v6 }
  0x13   :  { %343 = vmatpush3.bf16.msra.mxu0 %v384_v6  ;;  %375 = vmatpush3.bf16.msra.mxu1 %v384_v6 }
  0x14   :  { %344 = vmatprep.subr.bf16.mxu0 %v385_v7  ;;  %369 = vmatprep.subr.bf16.mxu1 %v385_v7 }
  0x17   :  { %345 = vmatpush3.bf16.msra.mxu0 %v385_v7  ;;  %376 = vmatpush3.bf16.msra.mxu1 %v385_v7 }
  0x18   :  { %378 = vmatprep.subr.msk.bf16.mxu0 %vm158_vm1, %v386_v8  ;;  %379 = vmatprep.subr.msk.bf16.mxu1 %vm158_vm1, %v386_v8 }
  0x1b   :  { %347 = vmatpush3.bf16.msra.mxu0 %v160_v9  ;;  %377 = vmatpush3.bf16.msra.mxu1 %v160_v9 }
  0x1e   :  { %349 = vmatmul.mubr.msk.bf16.vlgmr.msra.gmra.mrb[0].mxu0 %vm133_vm0, %v389_v10  ;;  %357 = vmatmul.mubr.msk.bf16.vlgmr.msra.gmra.mrb[0].mxu1 %vm133_vm0, %v390_v11 }
  0x1f   :  { %352 = vmatprep.mubr.msk.bf16.mxu0 %vm133_vm0, %v391_v12  ;;  %360 = vmatprep.mubr.msk.bf16.mxu1 %vm133_vm0, %v392_v13 }
  0x26   :  { %353 = vmatmul.mubr.msk.bf16.gmra.mrb[4].mxu0 %vm133_vm0, %v393_v14  ;;  %361 = vmatmul.mubr.msk.bf16.gmra.mrb[4].mxu1 %vm133_vm0, %v394_v15 }
  0xf1   :  { %v350_v17 = vpop.f32.mrb[0].mxu0  ;;  %v358_v18 = vpop.f32.mrb[0].mxu1 }
  0xf2   :  { %v205_v19 = vadd.f32 %v350_v17, %v295_v16  ;;  %v237_v20 = vadd.f32 %v358_v18, %v295_v16  ;;  %v196_v21 = vpop.f32.mrb[1].mxu0  ;;  %v228_v22 = vpop.f32.mrb[1].mxu1 }
  0xf3   :  { %v197_v23 = vadd.f32 %v295_v16, %v196_v21  ;;  %v229_v24 = vadd.f32 %v295_v16, %v228_v22  ;;  %v351_v25 = vpop.f32.mrb[2].mxu0  ;;  %v359_v26 = vpop.f32.mrb[2].mxu1 }
  0xf4   :  { %v261_v27 = vmax.f32 %v205_v19, 0.0  ;;  %v269_v28 = vmax.f32 %v237_v20, 0.0  ;;  %v208_v29 = vadd.f32 %v351_v25, %v295_v16  ;;  %v240_v30 = vadd.f32 %v359_v26, %v295_v16  ;;  %v199_v31 = vpop.f32.mrb[3].mxu0  ;;  %v231_v32 = vpop.f32.mrb[3].mxu1 }
  0xf5   :  { %v259_v33 = vmax.f32 %v197_v23, 0.0  ;;  %v267_v34 = vmax.f32 %v229_v24, 0.0  ;;  %v200_v35 = vadd.f32 %v295_v16, %v199_v31  ;;  %v232_v36 = vadd.f32 %v295_v16, %v231_v32 }
  0xf6   :  { %277 = vst [vmem:[%s522_s3 + $0x10] sm:$0xff] %v261_v27  ;;  %285 = vst [vmem:[%s522_s3 + $0x50] sm:$0xff] %v269_v28  ;;  %v262_v37 = vmax.f32 %v208_v29, 0.0  ;;  %v270_v38 = vmax.f32 %v240_v30, 0.0 }
  0xf7   :  { %275 = vst [vmem:[%s522_s3] sm:$0xff] %v259_v33  ;;  %283 = vst [vmem:[%s522_s3 + $0x40] sm:$0xff] %v267_v34  ;;  %v260_v39 = vmax.f32 %v200_v35, 0.0  ;;  %v268_v40 = vmax.f32 %v232_v36, 0.0 }
  0xf8   :  { %278 = vst [vmem:[%s522_s3 + $0x18] sm:$0xff] %v262_v37  ;;  %286 = vst [vmem:[%s522_s3 + $0x58] sm:$0xff] %v270_v38 }
  0xf9   :  { %276 = vst [vmem:[%s522_s3 + $0x8] sm:$0xff] %v260_v39  ;;  %284 = vst [vmem:[%s522_s3 + $0x48] sm:$0xff] %v268_v40  ;;  %v354_v41 = vpop.f32.mrb[4].mxu0  ;;  %v362_v42 = vpop.f32.mrb[4].mxu1 }
  0xfa   :  { %v221_v43 = vadd.f32 %v354_v41, %v295_v16  ;;  %v253_v44 = vadd.f32 %v362_v42, %v295_v16  ;;  %v212_v45 = vpop.f32.mrb[5].mxu0  ;;  %v244_v46 = vpop.f32.mrb[5].mxu1 }
  0xfb   :  { %v213_v47 = vadd.f32 %v295_v16, %v212_v45  ;;  %v245_v48 = vadd.f32 %v295_v16, %v244_v46  ;;  %v355_v49 = vpop.f32.mrb[6].mxu0  ;;  %v363_v50 = vpop.f32.mrb[6].mxu1 }
  0xfc   :  { %v265_v51 = vmax.f32 %v221_v43, 0.0  ;;  %v273_v52 = vmax.f32 %v253_v44, 0.0  ;;  %v224_v53 = vadd.f32 %v355_v49, %v295_v16  ;;  %v256_v54 = vadd.f32 %v363_v50, %v295_v16  ;;  %v215_v55 = vpop.f32.mrb[7].mxu0  ;;  %v247_v56 = vpop.f32.mrb[7].mxu1 }
  0xfd   :  { %v263_v57 = vmax.f32 %v213_v47, 0.0  ;;  %v271_v58 = vmax.f32 %v245_v48, 0.0  ;;  %v216_v59 = vadd.f32 %v295_v16, %v215_v55  ;;  %v248_v60 = vadd.f32 %v295_v16, %v247_v56 }
  0xfe   :  { %281 = vst [vmem:[%s522_s3 + $0x30] sm:$0xff] %v265_v51  ;;  %289 = vst [vmem:[%s522_s3 + $0x70] sm:$0xff] %v273_v52  ;;  %v266_v61 = vmax.f32 %v224_v53, 0.0  ;;  %v274_v62 = vmax.f32 %v256_v54, 0.0 }
  0xff   :  { %279 = vst [vmem:[%s522_s3 + $0x20] sm:$0xff] %v263_v57  ;;  %287 = vst [vmem:[%s522_s3 + $0x60] sm:$0xff] %v271_v58  ;;  %v264_v63 = vmax.f32 %v216_v59, 0.0  ;;  %v272_v0 = vmax.f32 %v248_v60, 0.0 }
 0x100   :  { %282 = vst [vmem:[%s522_s3 + $0x38] sm:$0xff] %v266_v61  ;;  %290 = vst [vmem:[%s522_s3 + $0x78] sm:$0xff] %v274_v62 }
 0x101   :  { %280 = vst [vmem:[%s522_s3 + $0x28] sm:$0xff] %v264_v63  ;;  %288 = vst [vmem:[%s522_s3 + $0x68] sm:$0xff] %v272_v0 }

// kernel: hourglass_forward.7
= control target key start
LH: loop header
LB: loop body
LE: loop exit
PB: predicated region body
PF: predicated region fallthrough
CT: control target
= control target key end

     0   :  { %v521_v0 = vmov 0   ;;  %vm221_vm0 = vcmask 719872   ;;  %vm246_vm1 = vcmask 1043456   ;;  %s790_s1 = inlined_call_operand.vmem [shape: bf16[216,128], index: 1, kind: input, shape index: {}]   ;;  %s791_s0 = inlined_call_operand.vmem [shape: bf16[128,216], index: 0, kind: input, shape index: {}]   ;;  %s792_s2 = inlined_call_operand.vmem [shape: f32[1,128], index: 2, kind: input, shape index: {}]   ;;  %s793_s3 = inlined_call_operand.vmem [shape: f32[128,128], index: 3, kind: input, shape index: {}]   ;;  %s794_s4 = inlined_call_operand.vmem [shape: f32[128,128], index: 4, kind: output, shape index: {}]  }
   0x1   :  { %250 = vmatprep.subr.bf16.mxu0 %v521_v0  ;;  %454 = vmatprep.subr.bf16.mxu1 %v521_v0  ;;  %v483_v1 = vld [vmem:[%s790_s1] sm:$0xff]   ;;  %v484_v2 = vld [vmem:[%s790_s1 + $0x8] sm:$0xff]   ;;  %v485_v3 = vld [vmem:[%s790_s1 + $0x10] sm:$0xff]  }
   0x2   :  { %251 = vmatpush1.bf16.msra.mxu0 %v483_v1  ;;  %468 = vmatpush1.bf16.msra.mxu1 %v483_v1  ;;  %v486_v4 = vld [vmem:[%s790_s1 + $0x18] sm:$0xff]   ;;  %v487_v5 = vld [vmem:[%s790_s1 + $0x20] sm:$0xff]   ;;  %v488_v8 = vld [vmem:[%s790_s1 + $0x28] sm:$0xff]  }
   0x3   :  { %252 = vmatprep.subr.bf16.mxu0 %v521_v0  ;;  %455 = vmatprep.subr.bf16.mxu1 %v521_v0  ;;  %v499_v6 = vld [vmem:[%s791_s0 + $0x4] ss:$8 sps:$4 sm:$0xff]   ;;  %v489_v9 = vld [vmem:[%s790_s1 + $0x30] sm:$0xff]   ;;  %v490_v10 = vld [vmem:[%s790_s1 + $0x38] sm:$0xff]  }
   0x4   :  { %446 = vmatprep.mubr.msk.bf16.mxu0 %vm221_vm0, %v499_v6  ;;  %v502_v7 = vld [vmem:[%s791_s0 + $0x44] ss:$8 sps:$4 sm:$0xff]   ;;  %v493_v13 = vld [vmem:[%s790_s1 + $0x50] sm:$0xff]   ;;  %v494_v14 = vld [vmem:[%s790_s1 + $0x58] sm:$0xff]  }
   0x5   :  { %450 = vmatprep.mubr.msk.bf16.mxu1 %vm221_vm0, %v502_v7  ;;  %v491_v11 = vld [vmem:[%s790_s1 + $0x40] sm:$0xff]   ;;  %v492_v12 = vld [vmem:[%s790_s1 + $0x48] sm:$0xff]   ;;  %v503_v20 = vld [vmem:[%s791_s0 + $0x14] ss:$8 sps:$4 sm:$0xff]  }
   0x6   :  { %253 = vmatpush1.bf16.msra.mxu0 %v484_v2  ;;  %469 = vmatpush1.bf16.msra.mxu1 %v484_v2  ;;  %v495_v15 = vld [vmem:[%s790_s1 + $0x60] sm:$0xff]   ;;  %v496_v16 = vld [vmem:[%s790_s1 + $0x68] ss:$0 sps:$4 sm:$0xff]   ;;  %v505_v21 = vld [vmem:[%s791_s0 + $0x54] ss:$8 sps:$4 sm:$0xff]  }
   0x7   :  { %254 = vmatprep.subr.bf16.mxu0 %v521_v0  ;;  %456 = vmatprep.subr.bf16.mxu1 %v521_v0  ;;  %v248_v17 = vsel %vm246_vm1, %v496_v16, 0  ;;  %v497_v18 = vld [vmem:[%s791_s0] ss:$8 sps:$4 sm:$0xff]   ;;  %v507_v22 = vld [vmem:[%s791_s0 + $0x10] ss:$8 sps:$4 sm:$0xff]  }
   0x8   :  { %v500_v19 = vld [vmem:[%s791_s0 + $0x40] ss:$8 sps:$4 sm:$0xff]   ;;  %v508_v23 = vld [vmem:[%s791_s0 + $0x50] ss:$8 sps:$4 sm:$0xff]   ;;  %v509_v24 = vld [vmem:[%s791_s0 + $0x24] ss:$8 sps:$4 sm:$0xff]  }
   0x9   :  { %v511_v25 = vld [vmem:[%s791_s0 + $0x64] ss:$8 sps:$4 sm:$0xff]   ;;  %v513_v26 = vld [vmem:[%s791_s0 + $0x20] ss:$8 sps:$4 sm:$0xff]   ;;  %v515_v28 = vld [vmem:[%s791_s0 + $0x34] ss:$8 sps:$4 sm:$0xff]  }
   0xa   :  { %255 = vmatpush1.bf16.msra.mxu0 %v485_v3  ;;  %470 = vmatpush1.bf16.msra.mxu1 %v485_v3  ;;  %v514_v27 = vld [vmem:[%s791_s0 + $0x60] ss:$8 sps:$4 sm:$0xff]   ;;  %v517_v29 = vld [vmem:[%s791_s0 + $0x74] ss:$8 sps:$4 sm:$0xff]   ;;  %v519_v30 = vld [vmem:[%s791_s0 + $0x30] ss:$8 sps:$4 sm:$0xff]  }
   0xb   :  { %256 = vmatprep.subr.bf16.mxu0 %v521_v0  ;;  %457 = vmatprep.subr.bf16.mxu1 %v521_v0  ;;  %v520_v31 = vld [vmem:[%s791_s0 + $0x70] ss:$8 sps:$4 sm:$0xff]   ;;  %v676_v32 = vld [vmem:[%s792_s2] ss:$0 sm:$0xff]  ;;  %v348_v42 = vld [vmem:[%s793_s3 + $0x8] sm:$0xff] }
   0xc   :  { %v347_v34 = vld [vmem:[%s793_s3] sm:$0xff]  ;;  %v356_v44 = vld [vmem:[%s793_s3 + $0x48] sm:$0xff]  ;;  %v349_v58 = vld [vmem:[%s793_s3 + $0x10] sm:$0xff] }
   0xd   :  { %v355_v36 = vld [vmem:[%s793_s3 + $0x40] sm:$0xff]  ;;  %v357_v60 = vld [vmem:[%s793_s3 + $0x50] sm:$0xff]  ;;  %v350_v2 = vld [vmem:[%s793_s3 + $0x18] sm:$0xff] }
   0xe   :  { %257 = vmatpush1.bf16.msra.mxu0 %v486_v4  ;;  %471 = vmatpush1.bf16.msra.mxu1 %v486_v4  ;;  %v358_v4 = vld [vmem:[%s793_s3 + $0x58] sm:$0xff] }
   0xf   :  { %258 = vmatprep.subr.bf16.mxu0 %v521_v0  ;;  %458 = vmatprep.subr.bf16.mxu1 %v521_v0 }
  0x12   :  { %259 = vmatpush1.bf16.msra.mxu0 %v487_v5  ;;  %472 = vmatpush1.bf16.msra.mxu1 %v487_v5 }
  0x13   :  { %260 = vmatprep.subr.bf16.mxu0 %v521_v0  ;;  %459 = vmatprep.subr.bf16.mxu1 %v521_v0 }
  0x16   :  { %261 = vmatpush1.bf16.msra.mxu0 %v488_v8  ;;  %473 = vmatpush1.bf16.msra.mxu1 %v488_v8 }
  0x17   :  { %262 = vmatprep.subr.bf16.mxu0 %v521_v0  ;;  %460 = vmatprep.subr.bf16.mxu1 %v521_v0 }
  0x1a   :  { %263 = vmatpush1.bf16.msra.mxu0 %v489_v9  ;;  %474 = vmatpush1.bf16.msra.mxu1 %v489_v9 }
  0x1b   :  { %264 = vmatprep.subr.bf16.mxu0 %v521_v0  ;;  %461 = vmatprep.subr.bf16.mxu1 %v521_v0 }
  0x1e   :  { %265 = vmatpush1.bf16.msra.mxu0 %v490_v10  ;;  %475 = vmatpush1.bf16.msra.mxu1 %v490_v10 }
  0x1f   :  { %266 = vmatprep.subr.bf16.mxu0 %v521_v0  ;;  %462 = vmatprep.subr.bf16.mxu1 %v521_v0 }
  0x22   :  { %267 = vmatpush1.bf16.msra.mxu0 %v491_v11  ;;  %476 = vmatpush1.bf16.msra.mxu1 %v491_v11 }
  0x23   :  { %268 = vmatprep.subr.bf16.mxu0 %v521_v0  ;;  %463 = vmatprep.subr.bf16.mxu1 %v521_v0 }
  0x26   :  { %269 = vmatpush1.bf16.msra.mxu0 %v492_v12  ;;  %477 = vmatpush1.bf16.msra.mxu1 %v492_v12 }
  0x27   :  { %270 = vmatprep.subr.bf16.mxu0 %v521_v0  ;;  %464 = vmatprep.subr.bf16.mxu1 %v521_v0 }
  0x2a   :  { %271 = vmatpush1.bf16.msra.mxu0 %v493_v13  ;;  %478 = vmatpush1.bf16.msra.mxu1 %v493_v13 }
  0x2b   :  { %272 = vmatprep.subr.bf16.mxu0 %v521_v0  ;;  %465 = vmatprep.subr.bf16.mxu1 %v521_v0 }
  0x2e   :  { %273 = vmatpush1.bf16.msra.mxu0 %v494_v14  ;;  %479 = vmatpush1.bf16.msra.mxu1 %v494_v14 }
  0x2f   :  { %274 = vmatprep.subr.bf16.mxu0 %v521_v0  ;;  %466 = vmatprep.subr.bf16.mxu1 %v521_v0 }
  0x32   :  { %275 = vmatpush1.bf16.msra.mxu0 %v495_v15  ;;  %480 = vmatpush1.bf16.msra.mxu1 %v495_v15 }
  0x33   :  { %276 = vmatprep.subr.bf16.mxu0 %v521_v0  ;;  %467 = vmatprep.subr.bf16.mxu1 %v521_v0 }
  0x36   :  { %277 = vmatpush1.bf16.msra.mxu0 %v248_v17  ;;  %481 = vmatpush1.bf16.msra.mxu1 %v248_v17 }
  0x39   :  { %283 = vmatmul.mubr.bf16.vlgmr.msra.gmra.mrb[0].mxu0 %v497_v18  ;;  %315 = vmatmul.mubr.bf16.vlgmr.msra.gmra.mrb[0].mxu1 %v500_v19  ;;  %v351_v18 = vld [vmem:[%s793_s3 + $0x20] sm:$0xff] }
  0x3a   :  { %447 = vmatprep.mubr.msk.bf16.mxu0 %vm221_vm0, %v503_v20  ;;  %451 = vmatprep.mubr.msk.bf16.mxu1 %vm221_vm0, %v505_v21  ;;  %v359_v20 = vld [vmem:[%s793_s3 + $0x60] sm:$0xff] }
  0x41   :  { %291 = vmatmul.mubr.bf16.gmra.mrb[4].mxu0 %v507_v22  ;;  %323 = vmatmul.mubr.bf16.gmra.mrb[4].mxu1 %v508_v23 }
  0x42   :  { %448 = vmatprep.mubr.msk.bf16.mxu0 %vm221_vm0, %v509_v24  ;;  %452 = vmatprep.mubr.msk.bf16.mxu1 %vm221_vm0, %v511_v25 }
  0x49   :  { %299 = vmatmul.mubr.bf16.gmra.mrb[8].mxu0 %v513_v26  ;;  %331 = vmatmul.mubr.bf16.gmra.mrb[8].mxu1 %v514_v27  ;;  %v352_v26 = vld [vmem:[%s793_s3 + $0x28] sm:$0xff] }
  0x4a   :  { %449 = vmatprep.mubr.msk.bf16.mxu0 %vm221_vm0, %v515_v28  ;;  %453 = vmatprep.mubr.msk.bf16.mxu1 %vm221_vm0, %v517_v29  ;;  %v360_v28 = vld [vmem:[%s793_s3 + $0x68] sm:$0xff] }
  0x51   :  { %307 = vmatmul.mubr.bf16.gmra.mrb[12].mxu0 %v519_v30  ;;  %339 = vmatmul.mubr.bf16.gmra.mrb[12].mxu1 %v520_v31 }
 0x10c   :  { %v284_v33 = vpop.f32.mrb[0].mxu0  ;;  %v316_v35 = vpop.f32.mrb[0].mxu1 }
 0x10d   :  { %v285_v37 = vadd.f32 %v676_v32, %v284_v33  ;;  %v317_v38 = vadd.f32 %v676_v32, %v316_v35  ;;  %v286_v39 = vpop.f32.mrb[1].mxu0  ;;  %v318_v40 = vpop.f32.mrb[1].mxu1 }
 0x10e   :  { %v287_v41 = vpop.f32.mrb[2].mxu0  ;;  %v319_v43 = vpop.f32.mrb[2].mxu1 }
 0x10f   :  { %v363_v45 = vadd.f32 %v347_v34, %v285_v37  ;;  %v371_v46 = vadd.f32 %v355_v36, %v317_v38  ;;  %v288_v47 = vadd.f32 %v676_v32, %v287_v41  ;;  %v320_v48 = vadd.f32 %v676_v32, %v319_v43  ;;  %v289_v49 = vpop.f32.mrb[3].mxu0  ;;  %v321_v50 = vpop.f32.mrb[3].mxu1  ;;  %v353_v43 = vld [vmem:[%s793_s3 + $0x30] sm:$0xff] }
 0x111   :  { %v379_v51 = vmax.f32 %v363_v45, 0.0  ;;  %v387_v52 = vmax.f32 %v371_v46, 0.0  ;;  %v364_v53 = vadd.f32 %v348_v42, %v288_v47  ;;  %v372_v54 = vadd.f32 %v356_v44, %v320_v48  ;;  %v361_v45 = vld [vmem:[%s793_s3 + $0x70] sm:$0xff] }
 0x113   :  { %395 = vst [vmem:[%s794_s4] sm:$0xff] %v379_v51  ;;  %403 = vst [vmem:[%s794_s4 + $0x40] sm:$0xff] %v387_v52  ;;  %v380_v55 = vmax.f32 %v364_v53, 0.0  ;;  %v388_v56 = vmax.f32 %v372_v54, 0.0  ;;  %v354_v51 = vld [vmem:[%s793_s3 + $0x38] sm:$0xff] }
 0x114   :  { %v292_v57 = vpop.f32.mrb[4].mxu0  ;;  %v324_v59 = vpop.f32.mrb[4].mxu1  ;;  %v362_v53 = vld [vmem:[%s793_s3 + $0x78] sm:$0xff] }
 0x115   :  { %396 = vst [vmem:[%s794_s4 + $0x8] sm:$0xff] %v380_v55  ;;  %404 = vst [vmem:[%s794_s4 + $0x48] sm:$0xff] %v388_v56  ;;  %v293_v61 = vadd.f32 %v676_v32, %v292_v57  ;;  %v325_v62 = vadd.f32 %v676_v32, %v324_v59  ;;  %v294_v63 = vpop.f32.mrb[5].mxu0  ;;  %v326_v0 = vpop.f32.mrb[5].mxu1 }
 0x116   :  { %v295_v1 = vpop.f32.mrb[6].mxu0  ;;  %v327_v3 = vpop.f32.mrb[6].mxu1 }
 0x117   :  { %v365_v5 = vadd.f32 %v349_v58, %v293_v61  ;;  %v373_v6 = vadd.f32 %v357_v60, %v325_v62  ;;  %v296_v7 = vadd.f32 %v676_v32, %v295_v1  ;;  %v328_v8 = vadd.f32 %v676_v32, %v327_v3  ;;  %v297_v9 = vpop.f32.mrb[7].mxu0  ;;  %v329_v10 = vpop.f32.mrb[7].mxu1 }
 0x119   :  { %v381_v11 = vmax.f32 %v365_v5, 0.0  ;;  %v389_v12 = vmax.f32 %v373_v6, 0.0  ;;  %v366_v13 = vadd.f32 %v350_v2, %v296_v7  ;;  %v374_v14 = vadd.f32 %v358_v4, %v328_v8 }
 0x11b   :  { %397 = vst [vmem:[%s794_s4 + $0x10] sm:$0xff] %v381_v11  ;;  %405 = vst [vmem:[%s794_s4 + $0x50] sm:$0xff] %v389_v12  ;;  %v382_v15 = vmax.f32 %v366_v13, 0.0  ;;  %v390_v16 = vmax.f32 %v374_v14, 0.0 }
 0x11c   :  { %v300_v17 = vpop.f32.mrb[8].mxu0  ;;  %v332_v19 = vpop.f32.mrb[8].mxu1 }
 0x11d   :  { %398 = vst [vmem:[%s794_s4 + $0x18] sm:$0xff] %v382_v15  ;;  %406 = vst [vmem:[%s794_s4 + $0x58] sm:$0xff] %v390_v16  ;;  %v301_v21 = vadd.f32 %v676_v32, %v300_v17  ;;  %v333_v22 = vadd.f32 %v676_v32, %v332_v19  ;;  %v302_v23 = vpop.f32.mrb[9].mxu0  ;;  %v334_v24 = vpop.f32.mrb[9].mxu1 }
 0x11e   :  { %v303_v25 = vpop.f32.mrb[10].mxu0  ;;  %v335_v27 = vpop.f32.mrb[10].mxu1 }
 0x11f   :  { %v367_v29 = vadd.f32 %v351_v18, %v301_v21  ;;  %v375_v30 = vadd.f32 %v359_v20, %v333_v22  ;;  %v304_v31 = vadd.f32 %v676_v32, %v303_v25  ;;  %v336_v33 = vadd.f32 %v676_v32, %v335_v27  ;;  %v305_v34 = vpop.f32.mrb[11].mxu0  ;;  %v337_v35 = vpop.f32.mrb[11].mxu1 }
 0x121   :  { %v383_v36 = vmax.f32 %v367_v29, 0.0  ;;  %v391_v37 = vmax.f32 %v375_v30, 0.0  ;;  %v368_v38 = vadd.f32 %v352_v26, %v304_v31  ;;  %v376_v39 = vadd.f32 %v360_v28, %v336_v33 }
 0x123   :  { %399 = vst [vmem:[%s794_s4 + $0x20] sm:$0xff] %v383_v36  ;;  %407 = vst [vmem:[%s794_s4 + $0x60] sm:$0xff] %v391_v37  ;;  %v384_v40 = vmax.f32 %v368_v38, 0.0  ;;  %v392_v41 = vmax.f32 %v376_v39, 0.0 }
 0x124   :  { %v308_v42 = vpop.f32.mrb[12].mxu0  ;;  %v340_v44 = vpop.f32.mrb[12].mxu1 }
 0x125   :  { %400 = vst [vmem:[%s794_s4 + $0x28] sm:$0xff] %v384_v40  ;;  %408 = vst [vmem:[%s794_s4 + $0x68] sm:$0xff] %v392_v41  ;;  %v309_v46 = vadd.f32 %v676_v32, %v308_v42  ;;  %v341_v47 = vadd.f32 %v676_v32, %v340_v44  ;;  %v310_v48 = vpop.f32.mrb[13].mxu0  ;;  %v342_v49 = vpop.f32.mrb[13].mxu1 }
 0x126   :  { %v311_v50 = vpop.f32.mrb[14].mxu0  ;;  %v343_v52 = vpop.f32.mrb[14].mxu1 }
 0x127   :  { %v369_v54 = vadd.f32 %v353_v43, %v309_v46  ;;  %v377_v55 = vadd.f32 %v361_v45, %v341_v47  ;;  %v312_v56 = vadd.f32 %v676_v32, %v311_v50  ;;  %v344_v57 = vadd.f32 %v676_v32, %v343_v52  ;;  %v313_v58 = vpop.f32.mrb[15].mxu0  ;;  %v345_v59 = vpop.f32.mrb[15].mxu1 }
 0x129   :  { %v385_v60 = vmax.f32 %v369_v54, 0.0  ;;  %v393_v61 = vmax.f32 %v377_v55, 0.0  ;;  %v370_v62 = vadd.f32 %v354_v51, %v312_v56  ;;  %v378_v63 = vadd.f32 %v362_v53, %v344_v57 }
 0x12b   :  { %401 = vst [vmem:[%s794_s4 + $0x30] sm:$0xff] %v385_v60  ;;  %409 = vst [vmem:[%s794_s4 + $0x70] sm:$0xff] %v393_v61  ;;  %v386_v0 = vmax.f32 %v370_v62, 0.0  ;;  %v394_v1 = vmax.f32 %v378_v63, 0.0 }
 0x12d   :  { %402 = vst [vmem:[%s794_s4 + $0x38] sm:$0xff] %v386_v0  ;;  %410 = vst [vmem:[%s794_s4 + $0x78] sm:$0xff] %v394_v1 }

// kernel: hourglass_forward.8
= control target key start
LH: loop header
LB: loop body
LE: loop exit
PB: predicated region body
PF: predicated region fallthrough
CT: control target
= control target key end

     0   :  { %v234_v0 = vmov 0   ;;  %vm141_vm0 = vcmask 719872   ;;  %vm145_vm1 = vcmask 1043456   ;;  %s312_s1 = inlined_call_operand.vmem [shape: bf16[216,128], index: 1, kind: input, shape index: {}]   ;;  %s313_s0 = inlined_call_operand.vmem [shape: bf16[16,216], index: 0, kind: input, shape index: {}]   ;;  %s314_s2 = inlined_call_operand.vmem [shape: f32[1,128], index: 2, kind: input, shape index: {}]   ;;  %s315_s3 = inlined_call_operand.vmem [shape: f32[16,128], index: 3, kind: output, shape index: {}]  }
   0x1   :  { %149 = vmatprep.subr.bf16.mxu0 %v234_v0  ;;  %v217_v1 = vld [vmem:[%s312_s1] sm:$0xff]   ;;  %v218_v2 = vld [vmem:[%s312_s1 + $0x8] sm:$0xff]   ;;  %v219_v3 = vld [vmem:[%s312_s1 + $0x10] sm:$0xff]  }
   0x2   :  { %150 = vmatpush1.bf16.msra.mxu0 %v217_v1  ;;  %v220_v4 = vld [vmem:[%s312_s1 + $0x18] sm:$0xff]   ;;  %v221_v5 = vld [vmem:[%s312_s1 + $0x20] sm:$0xff]   ;;  %v222_v7 = vld [vmem:[%s312_s1 + $0x28] sm:$0xff]  }
   0x3   :  { %151 = vmatprep.subr.bf16.mxu0 %v234_v0  ;;  %v233_v6 = vld [vmem:[%s313_s0 + $0x4] ss:$8 sps:$4 sm:$0xff]   ;;  %v223_v8 = vld [vmem:[%s312_s1 + $0x30] sm:$0xff]   ;;  %v224_v9 = vld [vmem:[%s312_s1 + $0x38] sm:$0xff]  }
   0x4   :  { %215 = vmatprep.mubr.msk.bf16.mxu0 %vm141_vm0, %v233_v6  ;;  %v225_v10 = vld [vmem:[%s312_s1 + $0x40] sm:$0xff]   ;;  %v226_v11 = vld [vmem:[%s312_s1 + $0x48] sm:$0xff]   ;;  %v227_v12 = vld [vmem:[%s312_s1 + $0x50] sm:$0xff]  }
   0x5   :  { %v228_v13 = vld [vmem:[%s312_s1 + $0x58] sm:$0xff]   ;;  %v229_v14 = vld [vmem:[%s312_s1 + $0x60] sm:$0xff]   ;;  %v230_v15 = vld [vmem:[%s312_s1 + $0x68] ss:$0 sps:$4 sm:$0xff]  }
   0x6   :  { %152 = vmatpush1.bf16.msra.mxu0 %v218_v2  ;;  %v147_v16 = vsel %vm145_vm1, %v230_v15, 0  ;;  %v231_v17 = vld [vmem:[%s313_s0] ss:$8 sps:$4 sm:$0xff]  }
   0x7   :  { %153 = vmatprep.subr.bf16.mxu0 %v234_v0  ;;  %v198_v18 = vld [vmem:[%s314_s2] ss:$0 sm:$0xff] }
   0xa   :  { %154 = vmatpush1.bf16.msra.mxu0 %v219_v3 }
   0xb   :  { %155 = vmatprep.subr.bf16.mxu0 %v234_v0 }
   0xe   :  { %156 = vmatpush1.bf16.msra.mxu0 %v220_v4 }
   0xf   :  { %157 = vmatprep.subr.bf16.mxu0 %v234_v0 }
  0x12   :  { %158 = vmatpush1.bf16.msra.mxu0 %v221_v5 }
  0x13   :  { %159 = vmatprep.subr.bf16.mxu0 %v234_v0 }
  0x16   :  { %160 = vmatpush1.bf16.msra.mxu0 %v222_v7 }
  0x17   :  { %161 = vmatprep.subr.bf16.mxu0 %v234_v0 }
  0x1a   :  { %162 = vmatpush1.bf16.msra.mxu0 %v223_v8 }
  0x1b   :  { %163 = vmatprep.subr.bf16.mxu0 %v234_v0 }
  0x1e   :  { %164 = vmatpush1.bf16.msra.mxu0 %v224_v9 }
  0x1f   :  { %165 = vmatprep.subr.bf16.mxu0 %v234_v0 }
  0x22   :  { %166 = vmatpush1.bf16.msra.mxu0 %v225_v10 }
  0x23   :  { %167 = vmatprep.subr.bf16.mxu0 %v234_v0 }
  0x26   :  { %168 = vmatpush1.bf16.msra.mxu0 %v226_v11 }
  0x27   :  { %169 = vmatprep.subr.bf16.mxu0 %v234_v0 }
  0x2a   :  { %170 = vmatpush1.bf16.msra.mxu0 %v227_v12 }
  0x2b   :  { %171 = vmatprep.subr.bf16.mxu0 %v234_v0 }
  0x2e   :  { %172 = vmatpush1.bf16.msra.mxu0 %v228_v13 }
  0x2f   :  { %173 = vmatprep.subr.bf16.mxu0 %v234_v0 }
  0x32   :  { %174 = vmatpush1.bf16.msra.mxu0 %v229_v14 }
  0x33   :  { %175 = vmatprep.subr.bf16.mxu0 %v234_v0 }
  0x36   :  { %176 = vmatpush1.bf16.msra.mxu0 %v147_v16 }
  0x39   :  { %182 = vmatmul.mubr.bf16.vlgmr.msra.gmra.mrb[0].mxu0 %v231_v17 }
 0x10c   :  { %v183_v19 = vpop.f32.mrb[0].mxu0 }
 0x10d   :  { %v184_v20 = vadd.f32 %v198_v18, %v183_v19  ;;  %v185_v21 = vpop.f32.mrb[1].mxu0 }
 0x10e   :  { %v186_v22 = vpop.f32.mrb[2].mxu0 }
 0x10f   :  { %v190_v23 = vmax.f32 %v184_v20, 0.0  ;;  %v187_v24 = vadd.f32 %v198_v18, %v186_v22  ;;  %v188_v25 = vpop.f32.mrb[3].mxu0 }
 0x111   :  { %192 = vst [vmem:[%s315_s3] sm:$0xff] %v190_v23  ;;  %v191_v26 = vmax.f32 %v187_v24, 0.0 }
 0x113   :  { %193 = vst [vmem:[%s315_s3 + $0x8] sm:$0xff] %v191_v26 }

// kernel: hourglass_forward.11
= control target key start
LH: loop header
LB: loop body
LE: loop exit
PB: predicated region body
PF: predicated region fallthrough
CT: control target
= control target key end

     0   :  { %s1455_s12 = smov 0   ;;  %s1782_s0 = inlined_call_operand.vmem [shape: bf16[1024,216], index: 0, kind: input, shape index: {}]   ;;  %s1783_s1 = inlined_call_operand.vmem [shape: bf16[216,128], index: 1, kind: input, shape index: {}]   ;;  %s1784_s2 = inlined_call_operand.vmem [shape: f32[1,128], index: 2, kind: input, shape index: {}]   ;;  %s1785_s3 = inlined_call_operand.vmem [shape: f32[1024,128], index: 3, kind: output, shape index: {}]  }
   0x1 LB: > { %s1155_s13 = sadd.s32 4294967295, %s1432_s12   ;;  %p1159_p0 = scmp.ge.s32.totalorder %s1432_s12, 1  ;;  %s1432_s12 = sphi %s1455_s12, %s13_s12  }
   0x2   : > { %p139_p1 = scmp.lt.s32.totalorder %s1432_s12, 3 }
   0x4   : > { %p140_p2 = pnand %p1159_p0, %p139_p1 }
   0x5   : > { %v1316_v0 = vld [vmem:[%s1783_s1] sm:$0xff] (!%p140_p2)   ;;  %v1434_v1 = vmov (!%p140_p2), 0   ;;  %v1317_v2 = vld [vmem:[%s1783_s1 + $0x8] sm:$0xff] (!%p140_p2)   ;;  %s1160_s18 = sshll.u32 (!%p140_p2), %s1155_s13, 6  ;;  %v1318_v3 = vld [vmem:[%s1783_s1 + $0x10] sm:$0xff] (!%p140_p2)   ;;  %vm645_vm0 = vcmask (!%p140_p2), 719872  }
   0x6   : > { %143 = sbr.rel (%p140_p2) target bundleno = 399 (0x18f), region = 32  ;;  %746 = vmatprep.subr.bf16.mxu0 (!%p140_p2), %v1434_v1  ;;  %1279 = vmatprep.subr.bf16.mxu1 (!%p140_p2), %v1434_v1  ;;  %p165_p3 = scmp.lt.s32.totalorder (!%p140_p2), %s1160_s18, 127  ;;  %v1319_v4 = vld [vmem:[%s1783_s1 + $0x18] sm:$0xff] (!%p140_p2)   ;;  %v1320_v5 = vld [vmem:[%s1783_s1 + $0x20] sm:$0xff] (!%p140_p2)   ;;  %v1321_v8 = vld [vmem:[%s1783_s1 + $0x28] sm:$0xff] (!%p140_p2)   ;;  %vm742_vm1 = vcmask (!%p140_p2), 1043456  }
   0x7   : > { %747 = vmatpush1.bf16.msra.mxu0 (!%p140_p2), %v1316_v0  ;;  %1293 = vmatpush1.bf16.msra.mxu1 (!%p140_p2), %v1316_v0  ;;  %v1322_v9 = vld [vmem:[%s1783_s1 + $0x30] sm:$0xff] (!%p140_p2)   ;;  %v1323_v10 = vld [vmem:[%s1783_s1 + $0x38] sm:$0xff] (!%p140_p2)   ;;  %v1324_v11 = vld [vmem:[%s1783_s1 + $0x40] sm:$0xff] (!%p140_p2)  }
   0x8   : > { %748 = vmatprep.subr.bf16.mxu0 (!%p140_p2), %v1434_v1  ;;  %1280 = vmatprep.subr.bf16.mxu1 (!%p140_p2), %v1434_v1  ;;  %v1325_v12 = vld [vmem:[%s1783_s1 + $0x48] sm:$0xff] (!%p140_p2)   ;;  %v1326_v13 = vld [vmem:[%s1783_s1 + $0x50] sm:$0xff] (!%p140_p2)   ;;  %v1327_v14 = vld [vmem:[%s1783_s1 + $0x58] sm:$0xff] (!%p140_p2)  }
   0x9   : > { %v1328_v15 = vld [vmem:[%s1783_s1 + $0x60] sm:$0xff] (!%p140_p2)   ;;  %v1329_v16 = vld [vmem:[%s1783_s1 + $0x68] ss:$0 sps:$4 sm:$0xff] (!%p140_p2)  }
   0xa   : > { %v744_v17 = vsel (!%p140_p2), %vm742_vm1, %v1329_v16, 0  ;;  %v1642_v16 = vld [vmem:[%s1784_s2] ss:$0 sm:$0xff] (!%p140_p2) }
   0xb   : > { %749 = vmatpush1.bf16.msra.mxu0 (!%p140_p2), %v1317_v2  ;;  %1294 = vmatpush1.bf16.msra.mxu1 (!%p140_p2), %v1317_v2 }
   0xc   : > { %750 = vmatprep.subr.bf16.mxu0 (!%p140_p2), %v1434_v1  ;;  %1281 = vmatprep.subr.bf16.mxu1 (!%p140_p2), %v1434_v1 }
   0xd   : > { %s1787_s18 = smov (!%p165_p3, %s1160_s18), 127 }
   0xe   : > { %s1278_s21 = sshll.u32 %s1787_s18, 3 }
   0xf   : > { %751 = vmatpush1.bf16.msra.mxu0 %v1318_v3  ;;  %1295 = vmatpush1.bf16.msra.mxu1 %v1318_v3  ;;  %s1491_s26 = scalar_lea.vmem %s1782_s0, %s1278_s21  ;;  %s1649_s28 = scalar_lea.vmem %s1785_s3, %s1278_s21 }
  0x10   : > { %752 = vmatprep.subr.bf16.mxu0 %v1434_v1  ;;  %1282 = vmatprep.subr.bf16.mxu1 %v1434_v1  ;;  %v1332_v6 = vld [vmem:[%s1491_s26 + $0x4] ss:$8 sps:$4 sm:$0xff]   ;;  %v1330_v18 = vld [vmem:[%s1491_s26] ss:$8 sps:$4 sm:$0xff]   ;;  %v1336_v20 = vld [vmem:[%s1491_s26 + $0x14] ss:$8 sps:$4 sm:$0xff]  }
  0x11   : > { %1244 = vmatprep.mubr.msk.bf16.mxu0 %vm645_vm0, %v1332_v6  ;;  %v1335_v7 = vld [vmem:[%s1491_s26 + $0x104] ss:$8 sps:$4 sm:$0xff]   ;;  %v1333_v19 = vld [vmem:[%s1491_s26 + $0x100] ss:$8 sps:$4 sm:$0xff]   ;;  %v1338_v21 = vld [vmem:[%s1491_s26 + $0x114] ss:$8 sps:$4 sm:$0xff]  }
  0x12   : > { %1260 = vmatprep.mubr.msk.bf16.mxu1 %vm645_vm0, %v1335_v7  ;;  %v1340_v22 = vld [vmem:[%s1491_s26 + $0x10] ss:$8 sps:$4 sm:$0xff]   ;;  %v1342_v24 = vld [vmem:[%s1491_s26 + $0x24] ss:$8 sps:$4 sm:$0xff]   ;;  %v1346_v26 = vld [vmem:[%s1491_s26 + $0x20] ss:$8 sps:$4 sm:$0xff]  }
  0x13   : > { %753 = vmatpush1.bf16.msra.mxu0 %v1319_v4  ;;  %1296 = vmatpush1.bf16.msra.mxu1 %v1319_v4  ;;  %v1341_v23 = vld [vmem:[%s1491_s26 + $0x110] ss:$8 sps:$4 sm:$0xff]   ;;  %v1344_v25 = vld [vmem:[%s1491_s26 + $0x124] ss:$8 sps:$4 sm:$0xff]   ;;  %v1347_v27 = vld [vmem:[%s1491_s26 + $0x120] ss:$8 sps:$4 sm:$0xff]  }
  0x14   : > { %754 = vmatprep.subr.bf16.mxu0 %v1434_v1  ;;  %1283 = vmatprep.subr.bf16.mxu1 %v1434_v1  ;;  %v1348_v28 = vld [vmem:[%s1491_s26 + $0x34] ss:$8 sps:$4 sm:$0xff]   ;;  %v1352_v30 = vld [vmem:[%s1491_s26 + $0x30] ss:$8 sps:$4 sm:$0xff]   ;;  %v1354_v32 = vld [vmem:[%s1491_s26 + $0x44] ss:$8 sps:$4 sm:$0xff]  }
  0x15   : > { %v1350_v29 = vld [vmem:[%s1491_s26 + $0x134] ss:$8 sps:$4 sm:$0xff]   ;;  %v1353_v31 = vld [vmem:[%s1491_s26 + $0x130] ss:$8 sps:$4 sm:$0xff]   ;;  %v1356_v33 = vld [vmem:[%s1491_s26 + $0x144] ss:$8 sps:$4 sm:$0xff]  }
  0x16   : > { %v1358_v34 = vld [vmem:[%s1491_s26 + $0x40] ss:$8 sps:$4 sm:$0xff]   ;;  %v1360_v36 = vld [vmem:[%s1491_s26 + $0x54] ss:$8 sps:$4 sm:$0xff]   ;;  %v1364_v38 = vld [vmem:[%s1491_s26 + $0x50] ss:$8 sps:$4 sm:$0xff]  }
  0x17   : > { %755 = vmatpush1.bf16.msra.mxu0 %v1320_v5  ;;  %1297 = vmatpush1.bf16.msra.mxu1 %v1320_v5  ;;  %v1359_v35 = vld [vmem:[%s1491_s26 + $0x140] ss:$8 sps:$4 sm:$0xff]   ;;  %v1362_v37 = vld [vmem:[%s1491_s26 + $0x154] ss:$8 sps:$4 sm:$0xff]   ;;  %v1365_v39 = vld [vmem:[%s1491_s26 + $0x150] ss:$8 sps:$4 sm:$0xff]  }
  0x18   : > { %756 = vmatprep.subr.bf16.mxu0 %v1434_v1  ;;  %1284 = vmatprep.subr.bf16.mxu1 %v1434_v1  ;;  %v1366_v40 = vld [vmem:[%s1491_s26 + $0x64] ss:$8 sps:$4 sm:$0xff]   ;;  %v1370_v42 = vld [vmem:[%s1491_s26 + $0x60] ss:$8 sps:$4 sm:$0xff]   ;;  %v1372_v44 = vld [vmem:[%s1491_s26 + $0x74] ss:$8 sps:$4 sm:$0xff]  }
  0x19   : > { %v1368_v41 = vld [vmem:[%s1491_s26 + $0x164] ss:$8 sps:$4 sm:$0xff]   ;;  %v1371_v43 = vld [vmem:[%s1491_s26 + $0x160] ss:$8 sps:$4 sm:$0xff]   ;;  %v1374_v45 = vld [vmem:[%s1491_s26 + $0x174] ss:$8 sps:$4 sm:$0xff]  }
  0x1a   : > { %v1376_v46 = vld [vmem:[%s1491_s26 + $0x70] ss:$8 sps:$4 sm:$0xff]   ;;  %v1378_v48 = vld [vmem:[%s1491_s26 + $0x84] ss:$8 sps:$4 sm:$0xff]   ;;  %v1382_v50 = vld [vmem:[%s1491_s26 + $0x80] ss:$8 sps:$4 sm:$0xff]  }
  0x1b   : > { %757 = vmatpush1.bf16.msra.mxu0 %v1321_v8  ;;  %1298 = vmatpush1.bf16.msra.mxu1 %v1321_v8  ;;  %v1377_v47 = vld [vmem:[%s1491_s26 + $0x170] ss:$8 sps:$4 sm:$0xff]   ;;  %v1380_v49 = vld [vmem:[%s1491_s26 + $0x184] ss:$8 sps:$4 sm:$0xff]   ;;  %v1383_v51 = vld [vmem:[%s1491_s26 + $0x180] ss:$8 sps:$4 sm:$0xff]  }
  0x1c   : > { %758 = vmatprep.subr.bf16.mxu0 %v1434_v1  ;;  %1285 = vmatprep.subr.bf16.mxu1 %v1434_v1  ;;  %v1384_v52 = vld [vmem:[%s1491_s26 + $0x94] ss:$8 sps:$4 sm:$0xff]   ;;  %v1388_v54 = vld [vmem:[%s1491_s26 + $0x90] ss:$8 sps:$4 sm:$0xff]   ;;  %v1390_v56 = vld [vmem:[%s1491_s26 + $0xa4] ss:$8 sps:$4 sm:$0xff]  }
  0x1d   : > { %v1386_v53 = vld [vmem:[%s1491_s26 + $0x194] ss:$8 sps:$4 sm:$0xff]   ;;  %v1389_v55 = vld [vmem:[%s1491_s26 + $0x190] ss:$8 sps:$4 sm:$0xff]   ;;  %v1392_v57 = vld [vmem:[%s1491_s26 + $0x1a4] ss:$8 sps:$4 sm:$0xff]  }
  0x1e   : > { %v1394_v58 = vld [vmem:[%s1491_s26 + $0xa0] ss:$8 sps:$4 sm:$0xff]   ;;  %v1396_v60 = vld [vmem:[%s1491_s26 + $0xb4] ss:$8 sps:$4 sm:$0xff]   ;;  %v1400_v62 = vld [vmem:[%s1491_s26 + $0xb0] ss:$8 sps:$4 sm:$0xff]  }
  0x1f   : > { %759 = vmatpush1.bf16.msra.mxu0 %v1322_v9  ;;  %1299 = vmatpush1.bf16.msra.mxu1 %v1322_v9  ;;  %v1395_v59 = vld [vmem:[%s1491_s26 + $0x1a0] ss:$8 sps:$4 sm:$0xff]   ;;  %v1398_v61 = vld [vmem:[%s1491_s26 + $0x1b4] ss:$8 sps:$4 sm:$0xff]   ;;  %v1401_v63 = vld [vmem:[%s1491_s26 + $0x1b0] ss:$8 sps:$4 sm:$0xff]  }
  0x20   : > { %760 = vmatprep.subr.bf16.mxu0 %v1434_v1  ;;  %1286 = vmatprep.subr.bf16.mxu1 %v1434_v1  ;;  %v1402_v0 = vld [vmem:[%s1491_s26 + $0xc4] ss:$8 sps:$4 sm:$0xff]   ;;  %v1406_v2 = vld [vmem:[%s1491_s26 + $0xc0] ss:$8 sps:$4 sm:$0xff]   ;;  %v1408_v4 = vld [vmem:[%s1491_s26 + $0xd4] ss:$8 sps:$4 sm:$0xff]  }
  0x21   : > { %v1407_v3 = vld [vmem:[%s1491_s26 + $0x1c0] ss:$8 sps:$4 sm:$0xff]   ;;  %v1410_v5 = vld [vmem:[%s1491_s26 + $0x1d4] ss:$8 sps:$4 sm:$0xff]   ;;  %v1412_v6 = vld [vmem:[%s1491_s26 + $0xd0] ss:$8 sps:$4 sm:$0xff]  }
  0x22   : > { %v1413_v7 = vld [vmem:[%s1491_s26 + $0x1d0] ss:$8 sps:$4 sm:$0xff]   ;;  %v1414_v8 = vld [vmem:[%s1491_s26 + $0xe4] ss:$8 sps:$4 sm:$0xff]  }
  0x23   : > { %761 = vmatpush1.bf16.msra.mxu0 %v1323_v10  ;;  %1300 = vmatpush1.bf16.msra.mxu1 %v1323_v10  ;;  %v1416_v9 = vld [vmem:[%s1491_s26 + $0x1e4] ss:$8 sps:$4 sm:$0xff]   ;;  %v1418_v10 = vld [vmem:[%s1491_s26 + $0xe0] ss:$8 sps:$4 sm:$0xff]  }
  0x24   : > { %762 = vmatprep.subr.bf16.mxu0 %v1434_v1  ;;  %1287 = vmatprep.subr.bf16.mxu1 %v1434_v1 }
  0x27   : > { %763 = vmatpush1.bf16.msra.mxu0 %v1324_v11  ;;  %1301 = vmatpush1.bf16.msra.mxu1 %v1324_v11  ;;  %v1419_v11 = vld [vmem:[%s1491_s26 + $0x1e0] ss:$8 sps:$4 sm:$0xff]  }
  0x28   : > { %764 = vmatprep.subr.bf16.mxu0 %v1434_v1  ;;  %1288 = vmatprep.subr.bf16.mxu1 %v1434_v1 }
  0x2b   : > { %765 = vmatpush1.bf16.msra.mxu0 %v1325_v12  ;;  %1302 = vmatpush1.bf16.msra.mxu1 %v1325_v12  ;;  %v1420_v12 = vld [vmem:[%s1491_s26 + $0xf4] ss:$8 sps:$4 sm:$0xff]  }
  0x2c   : > { %766 = vmatprep.subr.bf16.mxu0 %v1434_v1  ;;  %1289 = vmatprep.subr.bf16.mxu1 %v1434_v1 }
  0x2f   : > { %767 = vmatpush1.bf16.msra.mxu0 %v1326_v13  ;;  %1303 = vmatpush1.bf16.msra.mxu1 %v1326_v13  ;;  %v1422_v13 = vld [vmem:[%s1491_s26 + $0x1f4] ss:$8 sps:$4 sm:$0xff]  }
  0x30   : > { %768 = vmatprep.subr.bf16.mxu0 %v1434_v1  ;;  %1290 = vmatprep.subr.bf16.mxu1 %v1434_v1 }
  0x33   : > { %769 = vmatpush1.bf16.msra.mxu0 %v1327_v14  ;;  %1304 = vmatpush1.bf16.msra.mxu1 %v1327_v14  ;;  %v1424_v14 = vld [vmem:[%s1491_s26 + $0xf0] ss:$8 sps:$4 sm:$0xff]  }
  0x34   : > { %770 = vmatprep.subr.bf16.mxu0 %v1434_v1  ;;  %1291 = vmatprep.subr.bf16.mxu1 %v1434_v1 }
  0x37   : > { %771 = vmatpush1.bf16.msra.mxu0 %v1328_v15  ;;  %1305 = vmatpush1.bf16.msra.mxu1 %v1328_v15  ;;  %v1425_v15 = vld [vmem:[%s1491_s26 + $0x1f0] ss:$8 sps:$4 sm:$0xff]  }
  0x38   : > { %772 = vmatprep.subr.bf16.mxu0 %v1434_v1  ;;  %1292 = vmatprep.subr.bf16.mxu1 %v1434_v1  ;;  %v1404_v1 = vld [vmem:[%s1491_s26 + $0x1c4] ss:$8 sps:$4 sm:$0xff]  }
  0x3b   : > { %773 = vmatpush1.bf16.msra.mxu0 %v744_v17  ;;  %1306 = vmatpush1.bf16.msra.mxu1 %v744_v17 }
  0x3e   : > { %779 = vmatmul.mubr.bf16.vlgmr.msra.gmra.mrb[0].mxu0 %v1330_v18  ;;  %907 = vmatmul.mubr.bf16.vlgmr.msra.gmra.mrb[0].mxu1 %v1333_v19 }
  0x3f   : > { %1245 = vmatprep.mubr.msk.bf16.mxu0 %vm645_vm0, %v1336_v20  ;;  %1261 = vmatprep.mubr.msk.bf16.mxu1 %vm645_vm0, %v1338_v21 }
  0x46   : > { %787 = vmatmul.mubr.bf16.gmra.mrb[4].mxu0 %v1340_v22  ;;  %915 = vmatmul.mubr.bf16.gmra.mrb[4].mxu1 %v1341_v23 }
  0x47   : > { %1246 = vmatprep.mubr.msk.bf16.mxu0 %vm645_vm0, %v1342_v24  ;;  %1262 = vmatprep.mubr.msk.bf16.mxu1 %vm645_vm0, %v1344_v25 }
  0x4e   : > { %795 = vmatmul.mubr.bf16.gmra.mrb[8].mxu0 %v1346_v26  ;;  %923 = vmatmul.mubr.bf16.gmra.mrb[8].mxu1 %v1347_v27 }
  0x4f   : > { %1247 = vmatprep.mubr.msk.bf16.mxu0 %vm645_vm0, %v1348_v28  ;;  %1263 = vmatprep.mubr.msk.bf16.mxu1 %vm645_vm0, %v1350_v29 }
  0x56   : > { %803 = vmatmul.mubr.bf16.gmra.mrb[12].mxu0 %v1352_v30  ;;  %931 = vmatmul.mubr.bf16.gmra.mrb[12].mxu1 %v1353_v31 }
  0x57   : > { %1248 = vmatprep.mubr.msk.bf16.mxu0 %vm645_vm0, %v1354_v32  ;;  %1264 = vmatprep.mubr.msk.bf16.mxu1 %vm645_vm0, %v1356_v33 }
  0x5e   : > { %811 = vmatmul.mubr.bf16.gmra.mrb[16].mxu0 %v1358_v34  ;;  %939 = vmatmul.mubr.bf16.gmra.mrb[16].mxu1 %v1359_v35 }
  0x5f   : > { %1249 = vmatprep.mubr.msk.bf16.mxu0 %vm645_vm0, %v1360_v36  ;;  %1265 = vmatprep.mubr.msk.bf16.mxu1 %vm645_vm0, %v1362_v37 }
  0x66   : > { %819 = vmatmul.mubr.bf16.gmra.mrb[20].mxu0 %v1364_v38  ;;  %947 = vmatmul.mubr.bf16.gmra.mrb[20].mxu1 %v1365_v39 }
  0x67   : > { %1250 = vmatprep.mubr.msk.bf16.mxu0 %vm645_vm0, %v1366_v40  ;;  %1266 = vmatprep.mubr.msk.bf16.mxu1 %vm645_vm0, %v1368_v41 }
  0x6e   : > { %827 = vmatmul.mubr.bf16.gmra.mrb[24].mxu0 %v1370_v42  ;;  %955 = vmatmul.mubr.bf16.gmra.mrb[24].mxu1 %v1371_v43 }
  0x6f   : > { %1251 = vmatprep.mubr.msk.bf16.mxu0 %vm645_vm0, %v1372_v44  ;;  %1267 = vmatprep.mubr.msk.bf16.mxu1 %vm645_vm0, %v1374_v45 }
  0x76   : > { %835 = vmatmul.mubr.bf16.gmra.mrb[28].mxu0 %v1376_v46  ;;  %963 = vmatmul.mubr.bf16.gmra.mrb[28].mxu1 %v1377_v47 }
  0x77   : > { %1252 = vmatprep.mubr.msk.bf16.mxu0 %vm645_vm0, %v1378_v48  ;;  %1268 = vmatprep.mubr.msk.bf16.mxu1 %vm645_vm0, %v1380_v49 }
  0x7e   : > { %843 = vmatmul.mubr.bf16.gmra.mrb[32].mxu0 %v1382_v50  ;;  %971 = vmatmul.mubr.bf16.gmra.mrb[32].mxu1 %v1383_v51 }
  0x7f   : > { %1253 = vmatprep.mubr.msk.bf16.mxu0 %vm645_vm0, %v1384_v52  ;;  %1269 = vmatprep.mubr.msk.bf16.mxu1 %vm645_vm0, %v1386_v53 }
  0x86   : > { %851 = vmatmul.mubr.bf16.gmra.mrb[36].mxu0 %v1388_v54  ;;  %979 = vmatmul.mubr.bf16.gmra.mrb[36].mxu1 %v1389_v55 }
  0x87   : > { %1254 = vmatprep.mubr.msk.bf16.mxu0 %vm645_vm0, %v1390_v56  ;;  %1270 = vmatprep.mubr.msk.bf16.mxu1 %vm645_vm0, %v1392_v57 }
  0x8e   : > { %859 = vmatmul.mubr.bf16.gmra.mrb[40].mxu0 %v1394_v58  ;;  %987 = vmatmul.mubr.bf16.gmra.mrb[40].mxu1 %v1395_v59 }
  0x8f   : > { %1255 = vmatprep.mubr.msk.bf16.mxu0 %vm645_vm0, %v1396_v60  ;;  %1271 = vmatprep.mubr.msk.bf16.mxu1 %vm645_vm0, %v1398_v61 }
  0x96   : > { %867 = vmatmul.mubr.bf16.gmra.mrb[44].mxu0 %v1400_v62  ;;  %995 = vmatmul.mubr.bf16.gmra.mrb[44].mxu1 %v1401_v63 }
  0x97   : > { %1256 = vmatprep.mubr.msk.bf16.mxu0 %vm645_vm0, %v1402_v0  ;;  %1272 = vmatprep.mubr.msk.bf16.mxu1 %vm645_vm0, %v1404_v1 }
  0x9e   : > { %875 = vmatmul.mubr.bf16.gmra.mrb[48].mxu0 %v1406_v2  ;;  %1003 = vmatmul.mubr.bf16.gmra.mrb[48].mxu1 %v1407_v3 }
  0x9f   : > { %1257 = vmatprep.mubr.msk.bf16.mxu0 %vm645_vm0, %v1408_v4  ;;  %1273 = vmatprep.mubr.msk.bf16.mxu1 %vm645_vm0, %v1410_v5 }
  0xa6   : > { %883 = vmatmul.mubr.bf16.gmra.mrb[52].mxu0 %v1412_v6  ;;  %1011 = vmatmul.mubr.bf16.gmra.mrb[52].mxu1 %v1413_v7 }
  0xa7   : > { %1258 = vmatprep.mubr.msk.bf16.mxu0 %vm645_vm0, %v1414_v8  ;;  %1274 = vmatprep.mubr.msk.bf16.mxu1 %vm645_vm0, %v1416_v9 }
  0xae   : > { %891 = vmatmul.mubr.bf16.gmra.mrb[56].mxu0 %v1418_v10  ;;  %1019 = vmatmul.mubr.bf16.gmra.mrb[56].mxu1 %v1419_v11 }
  0xaf   : > { %1259 = vmatprep.mubr.msk.bf16.mxu0 %vm645_vm0, %v1420_v12  ;;  %1275 = vmatprep.mubr.msk.bf16.mxu1 %vm645_vm0, %v1422_v13 }
  0xb6   : > { %899 = vmatmul.mubr.bf16.gmra.mrb[60].mxu0 %v1424_v14  ;;  %1027 = vmatmul.mubr.bf16.gmra.mrb[60].mxu1 %v1425_v15 }
 0x111   : > { %v780_v17 = vpop.f32.mrb[0].mxu0  ;;  %v908_v18 = vpop.f32.mrb[0].mxu1 }
 0x112   : > { %v781_v19 = vadd.f32 %v1642_v16, %v780_v17  ;;  %v909_v20 = vadd.f32 %v1642_v16, %v908_v18  ;;  %v782_v21 = vpop.f32.mrb[1].mxu0  ;;  %v910_v22 = vpop.f32.mrb[1].mxu1 }
 0x113   : > { %v783_v23 = vpop.f32.mrb[2].mxu0  ;;  %v911_v24 = vpop.f32.mrb[2].mxu1 }
 0x114   : > { %1035 = vst [vmem:[%s1649_s28] sm:$0xff] %v781_v19  ;;  %1067 = vst [vmem:[%s1649_s28 + $0x100] sm:$0xff] %v909_v20  ;;  %v784_v25 = vadd.f32 %v1642_v16, %v783_v23  ;;  %v912_v26 = vadd.f32 %v1642_v16, %v911_v24  ;;  %v785_v27 = vpop.f32.mrb[3].mxu0  ;;  %v913_v28 = vpop.f32.mrb[3].mxu1 }
 0x116   : > { %1036 = vst [vmem:[%s1649_s28 + $0x8] sm:$0xff] %v784_v25  ;;  %1068 = vst [vmem:[%s1649_s28 + $0x108] sm:$0xff] %v912_v26 }
 0x119   : > { %v788_v29 = vpop.f32.mrb[4].mxu0  ;;  %v916_v30 = vpop.f32.mrb[4].mxu1 }
 0x11a   : > { %v789_v31 = vadd.f32 %v1642_v16, %v788_v29  ;;  %v917_v32 = vadd.f32 %v1642_v16, %v916_v30  ;;  %v790_v33 = vpop.f32.mrb[5].mxu0  ;;  %v918_v34 = vpop.f32.mrb[5].mxu1 }
 0x11b   : > { %v791_v35 = vpop.f32.mrb[6].mxu0  ;;  %v919_v36 = vpop.f32.mrb[6].mxu1 }
 0x11c   : > { %1037 = vst [vmem:[%s1649_s28 + $0x10] sm:$0xff] %v789_v31  ;;  %1069 = vst [vmem:[%s1649_s28 + $0x110] sm:$0xff] %v917_v32  ;;  %v792_v37 = vadd.f32 %v1642_v16, %v791_v35  ;;  %v920_v38 = vadd.f32 %v1642_v16, %v919_v36  ;;  %v793_v39 = vpop.f32.mrb[7].mxu0  ;;  %v921_v40 = vpop.f32.mrb[7].mxu1 }
 0x11e   : > { %1038 = vst [vmem:[%s1649_s28 + $0x18] sm:$0xff] %v792_v37  ;;  %1070 = vst [vmem:[%s1649_s28 + $0x118] sm:$0xff] %v920_v38 }
 0x121   : > { %v796_v41 = vpop.f32.mrb[8].mxu0  ;;  %v924_v42 = vpop.f32.mrb[8].mxu1 }
 0x122   : > { %v797_v43 = vadd.f32 %v1642_v16, %v796_v41  ;;  %v925_v44 = vadd.f32 %v1642_v16, %v924_v42  ;;  %v798_v45 = vpop.f32.mrb[9].mxu0  ;;  %v926_v46 = vpop.f32.mrb[9].mxu1 }
 0x123   : > { %v799_v47 = vpop.f32.mrb[10].mxu0  ;;  %v927_v48 = vpop.f32.mrb[10].mxu1 }
 0x124   : > { %1039 = vst [vmem:[%s1649_s28 + $0x20] sm:$0xff] %v797_v43  ;;  %1071 = vst [vmem:[%s1649_s28 + $0x120] sm:$0xff] %v925_v44  ;;  %v800_v49 = vadd.f32 %v1642_v16, %v799_v47  ;;  %v928_v50 = vadd.f32 %v1642_v16, %v927_v48  ;;  %v801_v51 = vpop.f32.mrb[11].mxu0  ;;  %v929_v52 = vpop.f32.mrb[11].mxu1 }
 0x126   : > { %1040 = vst [vmem:[%s1649_s28 + $0x28] sm:$0xff] %v800_v49  ;;  %1072 = vst [vmem:[%s1649_s28 + $0x128] sm:$0xff] %v928_v50 }
 0x129   : > { %v804_v53 = vpop.f32.mrb[12].mxu0  ;;  %v932_v54 = vpop.f32.mrb[12].mxu1 }
 0x12a   : > { %v805_v55 = vadd.f32 %v1642_v16, %v804_v53  ;;  %v933_v56 = vadd.f32 %v1642_v16, %v932_v54  ;;  %v806_v57 = vpop.f32.mrb[13].mxu0  ;;  %v934_v58 = vpop.f32.mrb[13].mxu1 }
 0x12b   : > { %v807_v59 = vpop.f32.mrb[14].mxu0  ;;  %v935_v60 = vpop.f32.mrb[14].mxu1 }
 0x12c   : > { %1041 = vst [vmem:[%s1649_s28 + $0x30] sm:$0xff] %v805_v55  ;;  %1073 = vst [vmem:[%s1649_s28 + $0x130] sm:$0xff] %v933_v56  ;;  %v808_v61 = vadd.f32 %v1642_v16, %v807_v59  ;;  %v936_v62 = vadd.f32 %v1642_v16, %v935_v60  ;;  %v809_v63 = vpop.f32.mrb[15].mxu0  ;;  %v937_v0 = vpop.f32.mrb[15].mxu1 }
 0x12e   : > { %1042 = vst [vmem:[%s1649_s28 + $0x38] sm:$0xff] %v808_v61  ;;  %1074 = vst [vmem:[%s1649_s28 + $0x138] sm:$0xff] %v936_v62 }
 0x131   : > { %v812_v1 = vpop.f32.mrb[16].mxu0  ;;  %v940_v2 = vpop.f32.mrb[16].mxu1 }
 0x132   : > { %v813_v3 = vadd.f32 %v1642_v16, %v812_v1  ;;  %v941_v4 = vadd.f32 %v1642_v16, %v940_v2  ;;  %v814_v5 = vpop.f32.mrb[17].mxu0  ;;  %v942_v6 = vpop.f32.mrb[17].mxu1 }
 0x133   : > { %v815_v7 = vpop.f32.mrb[18].mxu0  ;;  %v943_v8 = vpop.f32.mrb[18].mxu1 }
 0x134   : > { %1043 = vst [vmem:[%s1649_s28 + $0x40] sm:$0xff] %v813_v3  ;;  %1075 = vst [vmem:[%s1649_s28 + $0x140] sm:$0xff] %v941_v4  ;;  %v816_v9 = vadd.f32 %v1642_v16, %v815_v7  ;;  %v944_v10 = vadd.f32 %v1642_v16, %v943_v8  ;;  %v817_v11 = vpop.f32.mrb[19].mxu0  ;;  %v945_v12 = vpop.f32.mrb[19].mxu1 }
 0x136   : > { %1044 = vst [vmem:[%s1649_s28 + $0x48] sm:$0xff] %v816_v9  ;;  %1076 = vst [vmem:[%s1649_s28 + $0x148] sm:$0xff] %v944_v10 }
 0x139   : > { %v820_v13 = vpop.f32.mrb[20].mxu0  ;;  %v948_v14 = vpop.f32.mrb[20].mxu1 }
 0x13a   : > { %v821_v15 = vadd.f32 %v1642_v16, %v820_v13  ;;  %v949_v17 = vadd.f32 %v1642_v16, %v948_v14  ;;  %v822_v18 = vpop.f32.mrb[21].mxu0  ;;  %v950_v19 = vpop.f32.mrb[21].mxu1 }
 0x13b   : > { %v823_v20 = vpop.f32.mrb[22].mxu0  ;;  %v951_v21 = vpop.f32.mrb[22].mxu1 }
 0x13c   : > { %1045 = vst [vmem:[%s1649_s28 + $0x50] sm:$0xff] %v821_v15  ;;  %1077 = vst [vmem:[%s1649_s28 + $0x150] sm:$0xff] %v949_v17  ;;  %v824_v22 = vadd.f32 %v1642_v16, %v823_v20  ;;  %v952_v23 = vadd.f32 %v1642_v16, %v951_v21  ;;  %v825_v24 = vpop.f32.mrb[23].mxu0  ;;  %v953_v25 = vpop.f32.mrb[23].mxu1 }
 0x13e   : > { %1046 = vst [vmem:[%s1649_s28 + $0x58] sm:$0xff] %v824_v22  ;;  %1078 = vst [vmem:[%s1649_s28 + $0x158] sm:$0xff] %v952_v23 }
 0x141   : > { %v828_v26 = vpop.f32.mrb[24].mxu0  ;;  %v956_v27 = vpop.f32.mrb[24].mxu1 }
 0x142   : > { %v829_v28 = vadd.f32 %v1642_v16, %v828_v26  ;;  %v957_v29 = vadd.f32 %v1642_v16, %v956_v27  ;;  %v830_v30 = vpop.f32.mrb[25].mxu0  ;;  %v958_v31 = vpop.f32.mrb[25].mxu1 }
 0x143   : > { %v831_v32 = vpop.f32.mrb[26].mxu0  ;;  %v959_v33 = vpop.f32.mrb[26].mxu1 }
 0x144   : > { %1047 = vst [vmem:[%s1649_s28 + $0x60] sm:$0xff] %v829_v28  ;;  %1079 = vst [vmem:[%s1649_s28 + $0x160] sm:$0xff] %v957_v29  ;;  %v832_v34 = vadd.f32 %v1642_v16, %v831_v32  ;;  %v960_v35 = vadd.f32 %v1642_v16, %v959_v33  ;;  %v833_v36 = vpop.f32.mrb[27].mxu0  ;;  %v961_v37 = vpop.f32.mrb[27].mxu1 }
 0x146   : > { %1048 = vst [vmem:[%s1649_s28 + $0x68] sm:$0xff] %v832_v34  ;;  %1080 = vst [vmem:[%s1649_s28 + $0x168] sm:$0xff] %v960_v35 }
 0x149   : > { %v836_v38 = vpop.f32.mrb[28].mxu0  ;;  %v964_v39 = vpop.f32.mrb[28].mxu1 }
 0x14a   : > { %v837_v40 = vadd.f32 %v1642_v16, %v836_v38  ;;  %v965_v41 = vadd.f32 %v1642_v16, %v964_v39  ;;  %v838_v42 = vpop.f32.mrb[29].mxu0  ;;  %v966_v43 = vpop.f32.mrb[29].mxu1 }
 0x14b   : > { %v839_v44 = vpop.f32.mrb[30].mxu0  ;;  %v967_v45 = vpop.f32.mrb[30].mxu1 }
 0x14c   : > { %1049 = vst [vmem:[%s1649_s28 + $0x70] sm:$0xff] %v837_v40  ;;  %1081 = vst [vmem:[%s1649_s28 + $0x170] sm:$0xff] %v965_v41  ;;  %v840_v46 = vadd.f32 %v1642_v16, %v839_v44  ;;  %v968_v47 = vadd.f32 %v1642_v16, %v967_v45  ;;  %v841_v48 = vpop.f32.mrb[31].mxu0  ;;  %v969_v49 = vpop.f32.mrb[31].mxu1 }
 0x14e   : > { %1050 = vst [vmem:[%s1649_s28 + $0x78] sm:$0xff] %v840_v46  ;;  %1082 = vst [vmem:[%s1649_s28 + $0x178] sm:$0xff] %v968_v47 }
 0x151   : > { %v844_v50 = vpop.f32.mrb[32].mxu0  ;;  %v972_v51 = vpop.f32.mrb[32].mxu1 }
 0x152   : > { %v845_v52 = vadd.f32 %v1642_v16, %v844_v50  ;;  %v973_v53 = vadd.f32 %v1642_v16, %v972_v51  ;;  %v846_v54 = vpop.f32.mrb[33].mxu0  ;;  %v974_v55 = vpop.f32.mrb[33].mxu1 }
 0x153   : > { %v847_v56 = vpop.f32.mrb[34].mxu0  ;;  %v975_v57 = vpop.f32.mrb[34].mxu1 }
 0x154   : > { %1051 = vst [vmem:[%s1649_s28 + $0x80] sm:$0xff] %v845_v52  ;;  %1083 = vst [vmem:[%s1649_s28 + $0x180] sm:$0xff] %v973_v53  ;;  %v848_v58 = vadd.f32 %v1642_v16, %v847_v56  ;;  %v976_v59 = vadd.f32 %v1642_v16, %v975_v57  ;;  %v849_v60 = vpop.f32.mrb[35].mxu0  ;;  %v977_v61 = vpop.f32.mrb[35].mxu1 }
 0x156   : > { %1052 = vst [vmem:[%s1649_s28 + $0x88] sm:$0xff] %v848_v58  ;;  %1084 = vst [vmem:[%s1649_s28 + $0x188] sm:$0xff] %v976_v59 }
 0x159   : > { %v852_v62 = vpop.f32.mrb[36].mxu0  ;;  %v980_v63 = vpop.f32.mrb[36].mxu1 }
 0x15a   : > { %v853_v0 = vadd.f32 %v1642_v16, %v852_v62  ;;  %v981_v1 = vadd.f32 %v1642_v16, %v980_v63  ;;  %v854_v2 = vpop.f32.mrb[37].mxu0  ;;  %v982_v3 = vpop.f32.mrb[37].mxu1 }
 0x15b   : > { %v855_v4 = vpop.f32.mrb[38].mxu0  ;;  %v983_v5 = vpop.f32.mrb[38].mxu1 }
 0x15c   : > { %1053 = vst [vmem:[%s1649_s28 + $0x90] sm:$0xff] %v853_v0  ;;  %1085 = vst [vmem:[%s1649_s28 + $0x190] sm:$0xff] %v981_v1  ;;  %v856_v6 = vadd.f32 %v1642_v16, %v855_v4  ;;  %v984_v7 = vadd.f32 %v1642_v16, %v983_v5  ;;  %v857_v8 = vpop.f32.mrb[39].mxu0  ;;  %v985_v9 = vpop.f32.mrb[39].mxu1 }
 0x15e   : > { %1054 = vst [vmem:[%s1649_s28 + $0x98] sm:$0xff] %v856_v6  ;;  %1086 = vst [vmem:[%s1649_s28 + $0x198] sm:$0xff] %v984_v7 }
 0x161   : > { %v860_v10 = vpop.f32.mrb[40].mxu0  ;;  %v988_v11 = vpop.f32.mrb[40].mxu1 }
 0x162   : > { %v861_v12 = vadd.f32 %v1642_v16, %v860_v10  ;;  %v989_v13 = vadd.f32 %v1642_v16, %v988_v11  ;;  %v862_v14 = vpop.f32.mrb[41].mxu0  ;;  %v990_v15 = vpop.f32.mrb[41].mxu1 }
 0x163   : > { %v863_v17 = vpop.f32.mrb[42].mxu0  ;;  %v991_v18 = vpop.f32.mrb[42].mxu1 }
 0x164   : > { %1055 = vst [vmem:[%s1649_s28 + $0xa0] sm:$0xff] %v861_v12  ;;  %1087 = vst [vmem:[%s1649_s28 + $0x1a0] sm:$0xff] %v989_v13  ;;  %v864_v19 = vadd.f32 %v1642_v16, %v863_v17  ;;  %v992_v20 = vadd.f32 %v1642_v16, %v991_v18  ;;  %v865_v21 = vpop.f32.mrb[43].mxu0  ;;  %v993_v22 = vpop.f32.mrb[43].mxu1 }
 0x166   : > { %1056 = vst [vmem:[%s1649_s28 + $0xa8] sm:$0xff] %v864_v19  ;;  %1088 = vst [vmem:[%s1649_s28 + $0x1a8] sm:$0xff] %v992_v20 }
 0x169   : > { %v868_v23 = vpop.f32.mrb[44].mxu0  ;;  %v996_v24 = vpop.f32.mrb[44].mxu1 }
 0x16a   : > { %v869_v25 = vadd.f32 %v1642_v16, %v868_v23  ;;  %v997_v26 = vadd.f32 %v1642_v16, %v996_v24  ;;  %v870_v27 = vpop.f32.mrb[45].mxu0  ;;  %v998_v28 = vpop.f32.mrb[45].mxu1 }
 0x16b   : > { %v871_v29 = vpop.f32.mrb[46].mxu0  ;;  %v999_v30 = vpop.f32.mrb[46].mxu1 }
 0x16c   : > { %1057 = vst [vmem:[%s1649_s28 + $0xb0] sm:$0xff] %v869_v25  ;;  %1089 = vst [vmem:[%s1649_s28 + $0x1b0] sm:$0xff] %v997_v26  ;;  %v872_v31 = vadd.f32 %v1642_v16, %v871_v29  ;;  %v1000_v32 = vadd.f32 %v1642_v16, %v999_v30  ;;  %v873_v33 = vpop.f32.mrb[47].mxu0  ;;  %v1001_v34 = vpop.f32.mrb[47].mxu1 }
 0x16e   : > { %1058 = vst [vmem:[%s1649_s28 + $0xb8] sm:$0xff] %v872_v31  ;;  %1090 = vst [vmem:[%s1649_s28 + $0x1b8] sm:$0xff] %v1000_v32 }
 0x171   : > { %v876_v35 = vpop.f32.mrb[48].mxu0  ;;  %v1004_v36 = vpop.f32.mrb[48].mxu1 }
 0x172   : > { %v877_v37 = vadd.f32 %v1642_v16, %v876_v35  ;;  %v1005_v38 = vadd.f32 %v1642_v16, %v1004_v36  ;;  %v878_v39 = vpop.f32.mrb[49].mxu0  ;;  %v1006_v40 = vpop.f32.mrb[49].mxu1 }
 0x173   : > { %v879_v41 = vpop.f32.mrb[50].mxu0  ;;  %v1007_v42 = vpop.f32.mrb[50].mxu1 }
 0x174   : > { %1059 = vst [vmem:[%s1649_s28 + $0xc0] sm:$0xff] %v877_v37  ;;  %1091 = vst [vmem:[%s1649_s28 + $0x1c0] sm:$0xff] %v1005_v38  ;;  %v880_v43 = vadd.f32 %v1642_v16, %v879_v41  ;;  %v1008_v44 = vadd.f32 %v1642_v16, %v1007_v42  ;;  %v881_v45 = vpop.f32.mrb[51].mxu0  ;;  %v1009_v46 = vpop.f32.mrb[51].mxu1 }
 0x176   : > { %1060 = vst [vmem:[%s1649_s28 + $0xc8] sm:$0xff] %v880_v43  ;;  %1092 = vst [vmem:[%s1649_s28 + $0x1c8] sm:$0xff] %v1008_v44 }
 0x179   : > { %v884_v47 = vpop.f32.mrb[52].mxu0  ;;  %v1012_v48 = vpop.f32.mrb[52].mxu1 }
 0x17a   : > { %v885_v49 = vadd.f32 %v1642_v16, %v884_v47  ;;  %v1013_v50 = vadd.f32 %v1642_v16, %v1012_v48  ;;  %v886_v51 = vpop.f32.mrb[53].mxu0  ;;  %v1014_v52 = vpop.f32.mrb[53].mxu1 }
 0x17b   : > { %v887_v53 = vpop.f32.mrb[54].mxu0  ;;  %v1015_v54 = vpop.f32.mrb[54].mxu1 }
 0x17c   : > { %1061 = vst [vmem:[%s1649_s28 + $0xd0] sm:$0xff] %v885_v49  ;;  %1093 = vst [vmem:[%s1649_s28 + $0x1d0] sm:$0xff] %v1013_v50  ;;  %v888_v55 = vadd.f32 %v1642_v16, %v887_v53  ;;  %v1016_v56 = vadd.f32 %v1642_v16, %v1015_v54  ;;  %v889_v57 = vpop.f32.mrb[55].mxu0  ;;  %v1017_v58 = vpop.f32.mrb[55].mxu1 }
 0x17e   : > { %1062 = vst [vmem:[%s1649_s28 + $0xd8] sm:$0xff] %v888_v55  ;;  %1094 = vst [vmem:[%s1649_s28 + $0x1d8] sm:$0xff] %v1016_v56 }
 0x181   : > { %v892_v59 = vpop.f32.mrb[56].mxu0  ;;  %v1020_v60 = vpop.f32.mrb[56].mxu1 }
 0x182   : > { %v893_v61 = vadd.f32 %v1642_v16, %v892_v59  ;;  %v1021_v62 = vadd.f32 %v1642_v16, %v1020_v60  ;;  %v894_v63 = vpop.f32.mrb[57].mxu0  ;;  %v1022_v0 = vpop.f32.mrb[57].mxu1 }
 0x183   : > { %v895_v1 = vpop.f32.mrb[58].mxu0  ;;  %v1023_v2 = vpop.f32.mrb[58].mxu1 }
 0x184   : > { %1063 = vst [vmem:[%s1649_s28 + $0xe0] sm:$0xff] %v893_v61  ;;  %1095 = vst [vmem:[%s1649_s28 + $0x1e0] sm:$0xff] %v1021_v62  ;;  %v896_v3 = vadd.f32 %v1642_v16, %v895_v1  ;;  %v1024_v4 = vadd.f32 %v1642_v16, %v1023_v2  ;;  %v897_v5 = vpop.f32.mrb[59].mxu0  ;;  %v1025_v6 = vpop.f32.mrb[59].mxu1 }
 0x186   : > { %1064 = vst [vmem:[%s1649_s28 + $0xe8] sm:$0xff] %v896_v3  ;;  %1096 = vst [vmem:[%s1649_s28 + $0x1e8] sm:$0xff] %v1024_v4 }
 0x189   : > { %v900_v7 = vpop.f32.mrb[60].mxu0  ;;  %v1028_v8 = vpop.f32.mrb[60].mxu1 }
 0x18a   : > { %v901_v9 = vadd.f32 %v1642_v16, %v900_v7  ;;  %v1029_v10 = vadd.f32 %v1642_v16, %v1028_v8  ;;  %v902_v11 = vpop.f32.mrb[61].mxu0  ;;  %v1030_v12 = vpop.f32.mrb[61].mxu1 }
 0x18b   : > { %v903_v13 = vpop.f32.mrb[62].mxu0  ;;  %v1031_v14 = vpop.f32.mrb[62].mxu1 }
 0x18c   : > { %1065 = vst [vmem:[%s1649_s28 + $0xf0] sm:$0xff] %v901_v9  ;;  %1097 = vst [vmem:[%s1649_s28 + $0x1f0] sm:$0xff] %v1029_v10  ;;  %v904_v15 = vadd.f32 %v1642_v16, %v903_v13  ;;  %v1032_v17 = vadd.f32 %v1642_v16, %v1031_v14  ;;  %v905_v18 = vpop.f32.mrb[63].mxu0  ;;  %v1033_v19 = vpop.f32.mrb[63].mxu1 }
 0x18e   : > { %1066 = vst [vmem:[%s1649_s28 + $0xf8] sm:$0xff] %v904_v15  ;;  %1098 = vst [vmem:[%s1649_s28 + $0x1f8] sm:$0xff] %v1032_v17 }
 0x18f PF: > { %s13_s12 = sadd.s32 1, %s1432_s12  }
 0x190   : > { %p10_p4 = scmp.ge.s32.totalorder %s13_s12, 4  }
 0x192   :  { %12 = sbr.rel (!%p10_p4) target bundleno = 1 (0x1), region = 62 }

</bundles_post_ra>
